<compile_context>
chip_gen: v5e
topology: v5e:2x2
jax: 0.10.0
libtpu: 0.0.40
codegen_flags: <defaults>
</compile_context>

<pallas_src>
import jax
import jax.numpy as jnp
from jax import lax
from jax.experimental import pallas as pl
from jax.experimental.pallas import tpu as pltpu

# ---- PALM hyper-parameters (module __init__ defaults, shrunk to small shapes) ----
NVIEWS = 1            # must be 1 for the proto_class_counts matmul to be shape-consistent
NUM_CLASSES = 2
N_PROTOS = 16
CACHE_SIZE = N_PROTOS // NUM_CLASSES
PROTO_M = 0.99
TEMP = 0.1
LAMBDA_PCON = 1.0
K = min(5, CACHE_SIZE)
FEAT_DIM = 128
EPSILON = 0.05
SINKHORN_ITERS = 3
NORM_EPS = 1e-12      # torch.nn.functional.normalize eps

BATCH = 8
N = BATCH * NVIEWS
LANE = 128

_PREC_SINKHORN = lax.Precision.HIGHEST   # feeds exp(./0.05) + top-k selection: keep exact
_PREC_UPDATE = lax.Precision.DEFAULT     # EMA / count updates: 0.01-scaled, tolerance-insensitive

# exp-sharing between sinkhorn #2 and the MLE logits relies on this identity.
assert abs(1.0 / EPSILON - 2.0 / TEMP) < 1e-9, "exp-sharing requires 1/epsilon == 2/temp"
assert NVIEWS == 1, "proto_class_counts update is only shape-consistent for nviews == 1"


# ---------------------------------------------------------------------------
# shared math helpers (used inside the kernel and by the pure-JAX reference)
# ---------------------------------------------------------------------------
def _mm(a, b, ca, cb, precision):
    """dot_general contracting a[ca] with b[cb], f32 accumulation."""
    return lax.dot_general(a, b, (((ca,), (cb,)), ((), ())),
                           preferred_element_type=jnp.float32, precision=precision)


def _l1n(x, axis):
    s = jnp.sum(jnp.abs(x), axis=axis, keepdims=True)
    return x * (1.0 / jnp.maximum(s, NORM_EPS))     # divide only the reduced tensor


def _l2n(x, axis):
    n = jnp.sqrt(jnp.sum(x * x, axis=axis, keepdims=True))
    return x * (1.0 / jnp.maximum(n, NORM_EPS))


def _sinkhorn_from_q(q):
    # q = exp(out/eps) viewed as [N, P]; torch works on the transpose [P, N], so
    # the normalization axes are swapped accordingly (no transposes needed).
    q = q * (1.0 / jnp.sum(q, axis=(0, 1), keepdims=True))
    for _ in range(SINKHORN_ITERS):
        q = _l1n(q, axis=0) * (1.0 / N_PROTOS)       # torch: normalize(Q, dim=1) / K
        q = _l1n(q, axis=1) * (1.0 / N)              # torch: normalize(Q, dim=0) / B
    return q * N                                     # == Q.t() in torch


def _topk_mask(u):
    """Binary mask of the K largest entries per row via K iterative lane-max +
    mask-out steps (stays in the native [8,128] layout, no [N,P,P] relayout).
    Exact ties select together (candidates are strictly-positive sinkhorn
    weights for random data, so ties do not occur in practice)."""
    sel_total = jnp.zeros_like(u)
    cur = u
    for _ in range(K):
        m = jnp.max(cur, axis=1, keepdims=True)
        sel = (cur >= m).astype(jnp.float32)
        sel_total = jnp.maximum(sel_total, sel)
        cur = jnp.where(sel > 0.0, -jnp.inf, cur)
    return sel_total


# ---------------------------------------------------------------------------
# Pallas kernel: full PALM forward (mle_loss + proto_contra) + state update
# ---------------------------------------------------------------------------
def _palm_kernel(feats_ref, oh_ref, protos_ref, counts_ref,
                 loss_ref, new_protos_ref, new_counts_ref):
    feats = feats_ref[...]                            # [N, D]
    oh = oh_ref[...]                                  # [N, 128]  one-hot target in lanes [0, C)
    protos = protos_ref[...]                          # [P, D]

    # class-membership mask from the one-hot lanes + in-kernel iota proto labels
    plab = lax.broadcasted_iota(jnp.int32, (N, N_PROTOS), 1) % NUM_CLASSES
    mask = jnp.zeros((N, N_PROTOS), jnp.float32)
    for c in range(NUM_CLASSES):
        mask = mask + oh[:, c:c + 1] * (plab == c).astype(jnp.float32)

    # ---- sinkhorn #1 (old prototypes); global max-subtraction is exactly ------
    # cancelled by the normalizations and removes any exp overflow risk.
    out1 = _mm(feats, protos, 1, 1, _PREC_SINKHORN)   # [N, P]
    q1 = _sinkhorn_from_q(
        jnp.exp((out1 - jnp.max(out1, axis=(0, 1), keepdims=True)) * (1.0 / EPSILON)))
    um = mask * q1
    um = _l1n(_l1n(_topk_mask(um) * um, axis=1), axis=0)          # update_mask [N, P]

    # ---- prototype EMA + class-count update (two K=8 contractions) -----------
    upd_feat = _mm(um, feats, 0, 0, _PREC_UPDATE)                  # um.T @ feats -> [P, D]
    new_counts_ref[...] = counts_ref[...] + _mm(um, oh, 0, 0, _PREC_UPDATE)   # [P, 128]
    new_protos = _l2n(PROTO_M * protos + (1.0 - PROTO_M) * upd_feat, axis=1)
    new_protos_ref[...] = new_protos

    # ---- MLE loss with updated prototypes; single shared exp -----------------
    # exp(out/EPSILON) == exp(out/TEMP)^2 for the current hyper-params (asserted).
    out2 = _mm(feats, new_protos, 1, 1, _PREC_SINKHORN)            # [N, P]
    logits = out2 * (1.0 / TEMP)
    gmax = jnp.max(logits, axis=(0, 1), keepdims=True)
    e = jnp.exp(logits - gmax)
    q2 = _sinkhorn_from_q(e * e)
    support = (um > 0.0).astype(jnp.float32)          # == top-k mask of um (cheap compare)
    loss_mask = _l1n(support * (mask * q2), axis=1)
    pos = jnp.sum(loss_mask * logits, axis=1, keepdims=True)                  # [N, 1]
    neg = gmax + jnp.log(jnp.sum(e, axis=1, keepdims=True))                   # [N, 1]
    # torch averages the (N, N) broadcast of (pos - neg) == mean(pos) - mean(neg)
    mle = -(jnp.sum(pos, axis=(0, 1), keepdims=True)
            - jnp.sum(neg, axis=(0, 1), keepdims=True)) * (1.0 / N)           # (1, 1)

    # ---- prototype-contrastive loss (new_protos is already unit-norm) --------
    r = lax.broadcasted_iota(jnp.int32, (N_PROTOS, N_PROTOS), 0)
    c = lax.broadcasted_iota(jnp.int32, (N_PROTOS, N_PROTOS), 1)
    logits_mask = (r != c).astype(jnp.float32)                     # 1 - eye
    pos_w = (((r % NUM_CLASSES) == (c % NUM_CLASSES)).astype(jnp.float32)
             * logits_mask) * (1.0 / (CACHE_SIZE - 1))             # exact L1-normalized rows
    plogits = _mm(new_protos, new_protos, 1, 1, _PREC_SINKHORN) * 2.0   # / 0.5
    plogits = plogits - jnp.max(plogits, axis=1, keepdims=True)
    ppos = jnp.sum(pos_w * plogits, axis=1, keepdims=True)                    # [P, 1]
    pneg = jnp.log(jnp.sum(logits_mask * jnp.exp(plogits), axis=1, keepdims=True))
    pcon = -jnp.sum(ppos - pneg, axis=(0, 1), keepdims=True) * (1.0 / N_PROTOS)
    pcon_w = LAMBDA_PCON * pcon
    total = mle + pcon_w

    # pack [total, mle, lambda*pcon] into one lane-dense (1, 128) row
    lane = lax.broadcasted_iota(jnp.int32, (1, LANE), 1)
    zero_row = jnp.zeros((1, LANE), jnp.float32)
    loss_ref[...] = (jnp.where(lane == 0, total, zero_row)
                     + jnp.where(lane == 1, mle, zero_row)
                     + jnp.where(lane == 2, pcon_w, zero_row))


# ---------------------------------------------------------------------------
# wrapper (jit + donation; counts kept in padded [P, 128] layout as state)
# ---------------------------------------------------------------------------
def _palm_forward_impl(features, targets, protos, counts_pad):
    tgt = jnp.tile(targets, NVIEWS).astype(jnp.int32)              # [N]
    onehot128 = jax.nn.one_hot(tgt, LANE, dtype=jnp.float32)       # lane-dense one-hot slab

    vmem = pl.BlockSpec(memory_space=pltpu.MemorySpace.VMEM)
    cost = pl.CostEstimate(flops=200_000, transcendentals=600, bytes_accessed=42_000)

    loss_row, new_protos, new_counts_pad = pl.pallas_call(
        _palm_kernel,
        out_shape=(
            jax.ShapeDtypeStruct((1, LANE), jnp.float32),                # [loss, mle, pcon, 0...]
            jax.ShapeDtypeStruct((N_PROTOS, FEAT_DIM), jnp.float32),     # updated protos
            jax.ShapeDtypeStruct((N_PROTOS, LANE), jnp.float32),         # updated counts (padded)
        ),
        in_specs=[vmem, vmem, vmem, vmem],
        out_specs=(vmem, vmem, vmem),
        input_output_aliases={2: 1, 3: 2},   # protos -> new_protos, counts_pad -> new_counts_pad
        cost_estimate=cost,
    )(features.astype(jnp.float32), onehot128, protos, counts_pad)

    return loss_row[0, 0], loss_row[0, 1], loss_row[0, 2], new_protos, new_counts_pad


_palm_forward_jit = jax.jit(_palm_forward_impl, donate_argnums=(2, 3))


def init_proto_class_counts():
    """Persistent proto_class_counts state, kept lane-dense: [P, 128], classes in lanes [0, C)."""
    return jnp.zeros((N_PROTOS, LANE), jnp.float32)


def palm_forward(features, targets, protos, proto_class_counts_pad):
    """PALM.forward(features, targets, update_prototypes=True, unlabeled_features=None).

    protos and proto_class_counts_pad are donated and updated in place; the padded
    counts ([P, 128], valid classes in lanes [0, NUM_CLASSES)) are the persistent state.
    """
    # TODO(synk): unlabeled_features branch of forward() is not implemented (exercised with None).
    loss, mle, pcon_w, new_protos, new_counts_pad = _palm_forward_jit(
        features, targets, protos, proto_class_counts_pad)
    loss_dict = {"mle": mle, "proto_contra": pcon_w}   # device scalars, no host syncs
    return loss, loss_dict, new_protos, new_counts_pad


# ---------------------------------------------------------------------------
# pure-JAX reference (mirrors the PyTorch code op-for-op) for validation
# ---------------------------------------------------------------------------
def _ref_topk_mask(u):
    _, idx = lax.top_k(u, K)
    return jnp.zeros_like(u).at[jnp.arange(u.shape[0])[:, None], idx].set(1.0)


def palm_forward_ref(features, targets, protos, counts):
    hp = lax.Precision.HIGHEST
    tgt = jnp.tile(targets, NVIEWS)
    proto_lab = jnp.arange(N_PROTOS) % NUM_CLASSES
    mask = (tgt[:, None] == proto_lab[None, :]).astype(jnp.float32)
    q1 = _sinkhorn_from_q(jnp.exp(_mm(features, protos, 1, 1, hp) * (1.0 / EPSILON)))
    um = mask * q1
    um = _l1n(_l1n(_ref_topk_mask(um) * um, 1), 0)
    upd_feat = _mm(um, features, 0, 0, hp)
    onehot = jax.nn.one_hot(tgt, NUM_CLASSES, dtype=jnp.float32)
    new_counts = counts + _mm(um, onehot, 0, 0, hp)
    new_protos = _l2n(PROTO_M * protos + (1 - PROTO_M) * upd_feat, 1)
    q2 = _sinkhorn_from_q(jnp.exp(_mm(features, new_protos, 1, 1, hp) * (1.0 / EPSILON)))
    logits = _mm(features, new_protos, 1, 1, hp) * (1.0 / TEMP)
    loss_mask = _l1n(_ref_topk_mask(um) * (mask * q2), 1)
    pos = jnp.sum(loss_mask * logits, axis=1)
    neg = jnp.log(jnp.sum(jnp.exp(logits), axis=1))
    mle = -(jnp.mean(pos) - jnp.mean(neg))
    pr = _l2n(new_protos, 1)
    plog = _mm(pr, pr, 1, 1, hp) / 0.5
    plog = plog - jnp.max(plog, axis=1, keepdims=True)
    lm = 1.0 - jnp.eye(N_PROTOS, dtype=jnp.float32)
    pm = (proto_lab[:, None] == proto_lab[None, :]).astype(jnp.float32) * lm
    ppos = jnp.sum(_l1n(pm, 1) * plog, axis=1)
    pneg = jnp.log(jnp.sum(lm * jnp.exp(plog), axis=1))
    pcon = -jnp.mean(ppos - pneg)
    return mle + LAMBDA_PCON * pcon, new_protos, new_counts


if __name__ == "__main__":
    key = jax.random.PRNGKey(0)
    kf, kt, kp = jax.random.split(key, 3)

    features = jax.random.normal(kf, (N, FEAT_DIM), jnp.float32)
    features = features / jnp.linalg.norm(features, axis=1, keepdims=True)
    targets = jax.random.randint(kt, (BATCH,), 0, NUM_CLASSES, dtype=jnp.int32)
    # buffer init: randn prototypes, L2-normalized (as in __init__); counts start at zero.
    protos = jax.random.normal(kp, (N_PROTOS, FEAT_DIM), jnp.float32)
    protos = protos / jnp.linalg.norm(protos, axis=1, keepdims=True)
    counts_pad = init_proto_class_counts()

    # reference FIRST: protos / counts_pad are donated to the kernel call below.
    ref_loss, ref_protos, ref_counts = palm_forward_ref(
        features, targets, protos, counts_pad[:, :NUM_CLASSES])

    loss, loss_dict, new_protos, new_counts_pad = palm_forward(
        features, targets, protos, counts_pad)
    jax.block_until_ready((loss, loss_dict, new_protos, new_counts_pad))

    assert bool(jnp.isfinite(loss))
    assert jnp.allclose(loss, ref_loss, rtol=5e-3, atol=5e-3), (loss, ref_loss)
    assert jnp.allclose(new_protos, ref_protos, rtol=5e-3, atol=5e-3)
    assert jnp.allclose(new_counts_pad[:, :NUM_CLASSES], ref_counts, rtol=5e-3, atol=5e-3)

    print("KERNEL_OK")
</pallas_src>

<mosaic_0001>
module attributes {stable_mosaic.version = 11 : i64} {
  func.func @_palm_kernel(%arg0: memref<8x128xf32, #tpu.memory_space<vmem>>, %arg1: memref<8x128xf32, #tpu.memory_space<vmem>>, %arg2: memref<16x128xf32, #tpu.memory_space<vmem>>, %arg3: memref<16x128xf32, #tpu.memory_space<vmem>>, %arg4: memref<1x128xf32, #tpu.memory_space<vmem>>, %arg5: memref<16x128xf32, #tpu.memory_space<vmem>>, %arg6: memref<16x128xf32, #tpu.memory_space<vmem>>) attributes {dimension_semantics = [], scalar_prefetch = 0 : i64, scratch_operands = 0 : i64, tpu.core_type = #tpu.core_type<tc>} {
    %c0 = arith.constant 0 : index
    %c0_0 = arith.constant 0 : index
    %0 = vector.load %arg0[%c0, %c0_0] : memref<8x128xf32, #tpu.memory_space<vmem>>, vector<8x128xf32>
    %c0_1 = arith.constant 0 : index
    %c0_2 = arith.constant 0 : index
    %1 = vector.load %arg1[%c0_1, %c0_2] : memref<8x128xf32, #tpu.memory_space<vmem>>, vector<8x128xf32>
    %c0_3 = arith.constant 0 : index
    %c0_4 = arith.constant 0 : index
    %2 = vector.load %arg2[%c0_3, %c0_4] : memref<16x128xf32, #tpu.memory_space<vmem>>, vector<16x128xf32>
    %3 = tpu.iota {dimensions = array<i32: 1>} : vector<8x16xi32>
    %c2_i32 = arith.constant 2 : i32
    %c0_i32 = arith.constant 0 : i32
    %4 = arith.cmpi eq, %c2_i32, %c0_i32 : i32
    %c1_i32 = arith.constant 1 : i32
    %5 = arith.select %4, %c1_i32, %c2_i32 : i32
    %6 = vector.broadcast %5 : i32 to vector<8x16xi32>
    %7 = arith.remsi %3, %6 : vector<8x16xi32>
    %c0_i32_5 = arith.constant 0 : i32
    %8 = vector.broadcast %c0_i32_5 : i32 to vector<8x16xi32>
    %9 = arith.cmpi ne, %7, %8 : vector<8x16xi32>
    %c0_i32_6 = arith.constant 0 : i32
    %10 = vector.broadcast %c0_i32_6 : i32 to vector<8x16xi32>
    %11 = arith.cmpi slt, %7, %10 : vector<8x16xi32>
    %c0_i32_7 = arith.constant 0 : i32
    %12 = arith.cmpi slt, %5, %c0_i32_7 : i32
    %13 = vector.broadcast %12 : i1 to vector<8x16xi1>
    %14 = vector.broadcast %13 : vector<8x16xi1> to vector<8x16xi1>
    %15 = arith.xori %11, %14 : vector<8x16xi1>
    %16 = arith.andi %15, %9 : vector<8x16xi1>
    %17 = vector.broadcast %5 : i32 to vector<8x16xi32>
    %18 = arith.addi %7, %17 : vector<8x16xi32>
    %19 = arith.select %16, %18, %7 : vector<8x16xi1>, vector<8x16xi32>
    %cst = arith.constant 0.000000e+00 : f32
    %20 = vector.broadcast %cst : f32 to vector<8x16xf32>
    %21 = vector.extract_strided_slice %1 {offsets = [0, 0], sizes = [8, 1], strides = [1, 1]} : vector<8x128xf32> to vector<8x1xf32>
    %c0_i32_8 = arith.constant 0 : i32
    %22 = vector.broadcast %c0_i32_8 : i32 to vector<8x16xi32>
    %23 = arith.cmpi eq, %19, %22 : vector<8x16xi32>
    %24 = arith.extui %23 : vector<8x16xi1> to vector<8x16xi32>
    %25 = arith.sitofp %24 : vector<8x16xi32> to vector<8x16xf32>
    %26 = vector.broadcast %21 : vector<8x1xf32> to vector<8x16xf32>
    %27 = arith.mulf %26, %25 : vector<8x16xf32>
    %28 = arith.addf %20, %27 : vector<8x16xf32>
    %29 = vector.extract_strided_slice %1 {offsets = [0, 1], sizes = [8, 1], strides = [1, 1]} : vector<8x128xf32> to vector<8x1xf32>
    %c1_i32_9 = arith.constant 1 : i32
    %30 = vector.broadcast %c1_i32_9 : i32 to vector<8x16xi32>
    %31 = arith.cmpi eq, %19, %30 : vector<8x16xi32>
    %32 = arith.extui %31 : vector<8x16xi1> to vector<8x16xi32>
    %33 = arith.sitofp %32 : vector<8x16xi32> to vector<8x16xf32>
    %34 = vector.broadcast %29 : vector<8x1xf32> to vector<8x16xf32>
    %35 = arith.mulf %34, %33 : vector<8x16xf32>
    %36 = arith.addf %28, %35 : vector<8x16xf32>
    %cst_10 = arith.constant dense<0.000000e+00> : vector<8x16xf32>
    %37 = tpu.matmul %0, %2, %cst_10 {dimension_numbers = #tpu.dot_dimension_numbers<[1], [1], [0], [0], [0, 0, 1, 0], [], []>, precision = #tpu.contract_precision<fp32>} : vector<8x128xf32>, vector<16x128xf32>, vector<8x16xf32> -> vector<8x16xf32>
    %38 = vector.shape_cast %37 : vector<8x16xf32> to vector<1x8x16xf32>
    %cst_11 = arith.constant dense<0xFF800000> : vector<1xf32>
    %39 = vector.multi_reduction <maximumf>, %38, %cst_11 [1, 2] : vector<1x8x16xf32> to vector<1xf32>
    %40 = vector.shape_cast %39 : vector<1xf32> to vector<1x1x1xf32>
    %41 = vector.extract %40[0, 0, 0] : f32 from vector<1x1x1xf32>
    %42 = vector.broadcast %41 : f32 to vector<1x1xf32>
    %43 = vector.broadcast %42 : vector<1x1xf32> to vector<8x16xf32>
    %44 = arith.subf %37, %43 : vector<8x16xf32>
    %cst_12 = arith.constant 2.000000e+01 : f32
    %45 = vector.broadcast %cst_12 : f32 to vector<8x16xf32>
    %46 = arith.mulf %44, %45 : vector<8x16xf32>
    %47 = math.exp %46 : vector<8x16xf32>
    %48 = vector.shape_cast %47 : vector<8x16xf32> to vector<1x8x16xf32>
    %cst_13 = arith.constant dense<0.000000e+00> : vector<1xf32>
    %49 = vector.multi_reduction <add>, %48, %cst_13 [1, 2] : vector<1x8x16xf32> to vector<1xf32>
    %50 = vector.shape_cast %49 : vector<1xf32> to vector<1x1x1xf32>
    %51 = vector.extract %50[0, 0, 0] : f32 from vector<1x1x1xf32>
    %52 = vector.broadcast %51 : f32 to vector<1x1xf32>
    %cst_14 = arith.constant 1.000000e+00 : f32
    %53 = vector.broadcast %cst_14 : f32 to vector<1x1xf32>
    %54 = arith.divf %53, %52 : vector<1x1xf32>
    %55 = vector.broadcast %54 : vector<1x1xf32> to vector<8x16xf32>
    %56 = arith.mulf %47, %55 : vector<8x16xf32>
    %57 = math.absf %56 : vector<8x16xf32>
    %cst_15 = arith.constant dense<0.000000e+00> : vector<16xf32>
    %58 = vector.multi_reduction <add>, %57, %cst_15 [0] : vector<8x16xf32> to vector<16xf32>
    %59 = vector.shape_cast %58 : vector<16xf32> to vector<1x16xf32>
    %cst_16 = arith.constant 9.99999996E-13 : f32
    %60 = vector.broadcast %cst_16 : f32 to vector<1x16xf32>
    %61 = arith.maximumf %59, %60 : vector<1x16xf32>
    %cst_17 = arith.constant 1.000000e+00 : f32
    %62 = vector.broadcast %cst_17 : f32 to vector<1x16xf32>
    %63 = arith.divf %62, %61 : vector<1x16xf32>
    %64 = vector.broadcast %63 : vector<1x16xf32> to vector<8x16xf32>
    %65 = arith.mulf %56, %64 : vector<8x16xf32>
    %cst_18 = arith.constant 6.250000e-02 : f32
    %66 = vector.broadcast %cst_18 : f32 to vector<8x16xf32>
    %67 = arith.mulf %65, %66 : vector<8x16xf32>
    %68 = math.absf %67 : vector<8x16xf32>
    %cst_19 = arith.constant dense<0.000000e+00> : vector<8xf32>
    %69 = vector.multi_reduction <add>, %68, %cst_19 [1] : vector<8x16xf32> to vector<8xf32>
    %70 = vector.shape_cast %69 : vector<8xf32> to vector<8x1xf32>
    %cst_20 = arith.constant 9.99999996E-13 : f32
    %71 = vector.broadcast %cst_20 : f32 to vector<8x1xf32>
    %72 = arith.maximumf %70, %71 : vector<8x1xf32>
    %cst_21 = arith.constant 1.000000e+00 : f32
    %73 = vector.broadcast %cst_21 : f32 to vector<8x1xf32>
    %74 = arith.divf %73, %72 : vector<8x1xf32>
    %75 = vector.broadcast %74 : vector<8x1xf32> to vector<8x16xf32>
    %76 = arith.mulf %67, %75 : vector<8x16xf32>
    %cst_22 = arith.constant 1.250000e-01 : f32
    %77 = vector.broadcast %cst_22 : f32 to vector<8x16xf32>
    %78 = arith.mulf %76, %77 : vector<8x16xf32>
    %79 = math.absf %78 : vector<8x16xf32>
    %cst_23 = arith.constant dense<0.000000e+00> : vector<16xf32>
    %80 = vector.multi_reduction <add>, %79, %cst_23 [0] : vector<8x16xf32> to vector<16xf32>
    %81 = vector.shape_cast %80 : vector<16xf32> to vector<1x16xf32>
    %cst_24 = arith.constant 9.99999996E-13 : f32
    %82 = vector.broadcast %cst_24 : f32 to vector<1x16xf32>
    %83 = arith.maximumf %81, %82 : vector<1x16xf32>
    %cst_25 = arith.constant 1.000000e+00 : f32
    %84 = vector.broadcast %cst_25 : f32 to vector<1x16xf32>
    %85 = arith.divf %84, %83 : vector<1x16xf32>
    %86 = vector.broadcast %85 : vector<1x16xf32> to vector<8x16xf32>
    %87 = arith.mulf %78, %86 : vector<8x16xf32>
    %cst_26 = arith.constant 6.250000e-02 : f32
    %88 = vector.broadcast %cst_26 : f32 to vector<8x16xf32>
    %89 = arith.mulf %87, %88 : vector<8x16xf32>
    %90 = math.absf %89 : vector<8x16xf32>
    %cst_27 = arith.constant dense<0.000000e+00> : vector<8xf32>
    %91 = vector.multi_reduction <add>, %90, %cst_27 [1] : vector<8x16xf32> to vector<8xf32>
    %92 = vector.shape_cast %91 : vector<8xf32> to vector<8x1xf32>
    %cst_28 = arith.constant 9.99999996E-13 : f32
    %93 = vector.broadcast %cst_28 : f32 to vector<8x1xf32>
    %94 = arith.maximumf %92, %93 : vector<8x1xf32>
    %cst_29 = arith.constant 1.000000e+00 : f32
    %95 = vector.broadcast %cst_29 : f32 to vector<8x1xf32>
    %96 = arith.divf %95, %94 : vector<8x1xf32>
    %97 = vector.broadcast %96 : vector<8x1xf32> to vector<8x16xf32>
    %98 = arith.mulf %89, %97 : vector<8x16xf32>
    %cst_30 = arith.constant 1.250000e-01 : f32
    %99 = vector.broadcast %cst_30 : f32 to vector<8x16xf32>
    %100 = arith.mulf %98, %99 : vector<8x16xf32>
    %101 = math.absf %100 : vector<8x16xf32>
    %cst_31 = arith.constant dense<0.000000e+00> : vector<16xf32>
    %102 = vector.multi_reduction <add>, %101, %cst_31 [0] : vector<8x16xf32> to vector<16xf32>
    %103 = vector.shape_cast %102 : vector<16xf32> to vector<1x16xf32>
    %cst_32 = arith.constant 9.99999996E-13 : f32
    %104 = vector.broadcast %cst_32 : f32 to vector<1x16xf32>
    %105 = arith.maximumf %103, %104 : vector<1x16xf32>
    %cst_33 = arith.constant 1.000000e+00 : f32
    %106 = vector.broadcast %cst_33 : f32 to vector<1x16xf32>
    %107 = arith.divf %106, %105 : vector<1x16xf32>
    %108 = vector.broadcast %107 : vector<1x16xf32> to vector<8x16xf32>
    %109 = arith.mulf %100, %108 : vector<8x16xf32>
    %cst_34 = arith.constant 6.250000e-02 : f32
    %110 = vector.broadcast %cst_34 : f32 to vector<8x16xf32>
    %111 = arith.mulf %109, %110 : vector<8x16xf32>
    %112 = math.absf %111 : vector<8x16xf32>
    %cst_35 = arith.constant dense<0.000000e+00> : vector<8xf32>
    %113 = vector.multi_reduction <add>, %112, %cst_35 [1] : vector<8x16xf32> to vector<8xf32>
    %114 = vector.shape_cast %113 : vector<8xf32> to vector<8x1xf32>
    %cst_36 = arith.constant 9.99999996E-13 : f32
    %115 = vector.broadcast %cst_36 : f32 to vector<8x1xf32>
    %116 = arith.maximumf %114, %115 : vector<8x1xf32>
    %cst_37 = arith.constant 1.000000e+00 : f32
    %117 = vector.broadcast %cst_37 : f32 to vector<8x1xf32>
    %118 = arith.divf %117, %116 : vector<8x1xf32>
    %119 = vector.broadcast %118 : vector<8x1xf32> to vector<8x16xf32>
    %120 = arith.mulf %111, %119 : vector<8x16xf32>
    %cst_38 = arith.constant 1.250000e-01 : f32
    %121 = vector.broadcast %cst_38 : f32 to vector<8x16xf32>
    %122 = arith.mulf %120, %121 : vector<8x16xf32>
    %cst_39 = arith.constant 8.000000e+00 : f32
    %123 = vector.broadcast %cst_39 : f32 to vector<8x16xf32>
    %124 = arith.mulf %122, %123 : vector<8x16xf32>
    %125 = arith.mulf %36, %124 : vector<8x16xf32>
    %cst_40 = arith.constant 0.000000e+00 : f32
    %126 = vector.broadcast %cst_40 : f32 to vector<8x16xf32>
    %cst_41 = arith.constant dense<0xFF800000> : vector<8xf32>
    %127 = vector.multi_reduction <maximumf>, %125, %cst_41 [1] : vector<8x16xf32> to vector<8xf32>
    %128 = vector.shape_cast %127 : vector<8xf32> to vector<8x1xf32>
    %129 = vector.broadcast %128 : vector<8x1xf32> to vector<8x16xf32>
    %130 = arith.cmpf oge, %125, %129 : vector<8x16xf32>
    %131 = arith.extui %130 : vector<8x16xi1> to vector<8x16xi32>
    %132 = arith.sitofp %131 : vector<8x16xi32> to vector<8x16xf32>
    %133 = arith.maximumf %126, %132 : vector<8x16xf32>
    %cst_42 = arith.constant 0.000000e+00 : f32
    %134 = vector.broadcast %cst_42 : f32 to vector<8x16xf32>
    %135 = arith.cmpf ogt, %132, %134 : vector<8x16xf32>
    %cst_43 = arith.constant 0xFF800000 : f32
    %136 = vector.broadcast %cst_43 : f32 to vector<8x16xf32>
    %137 = arith.select %135, %136, %125 : vector<8x16xi1>, vector<8x16xf32>
    %cst_44 = arith.constant dense<0xFF800000> : vector<8xf32>
    %138 = vector.multi_reduction <maximumf>, %137, %cst_44 [1] : vector<8x16xf32> to vector<8xf32>
    %139 = vector.shape_cast %138 : vector<8xf32> to vector<8x1xf32>
    %140 = vector.broadcast %139 : vector<8x1xf32> to vector<8x16xf32>
    %141 = arith.cmpf oge, %137, %140 : vector<8x16xf32>
    %142 = arith.extui %141 : vector<8x16xi1> to vector<8x16xi32>
    %143 = arith.sitofp %142 : vector<8x16xi32> to vector<8x16xf32>
    %144 = arith.maximumf %133, %143 : vector<8x16xf32>
    %cst_45 = arith.constant 0.000000e+00 : f32
    %145 = vector.broadcast %cst_45 : f32 to vector<8x16xf32>
    %146 = arith.cmpf ogt, %143, %145 : vector<8x16xf32>
    %cst_46 = arith.constant 0xFF800000 : f32
    %147 = vector.broadcast %cst_46 : f32 to vector<8x16xf32>
    %148 = arith.select %146, %147, %137 : vector<8x16xi1>, vector<8x16xf32>
    %cst_47 = arith.constant dense<0xFF800000> : vector<8xf32>
    %149 = vector.multi_reduction <maximumf>, %148, %cst_47 [1] : vector<8x16xf32> to vector<8xf32>
    %150 = vector.shape_cast %149 : vector<8xf32> to vector<8x1xf32>
    %151 = vector.broadcast %150 : vector<8x1xf32> to vector<8x16xf32>
    %152 = arith.cmpf oge, %148, %151 : vector<8x16xf32>
    %153 = arith.extui %152 : vector<8x16xi1> to vector<8x16xi32>
    %154 = arith.sitofp %153 : vector<8x16xi32> to vector<8x16xf32>
    %155 = arith.maximumf %144, %154 : vector<8x16xf32>
    %cst_48 = arith.constant 0.000000e+00 : f32
    %156 = vector.broadcast %cst_48 : f32 to vector<8x16xf32>
    %157 = arith.cmpf ogt, %154, %156 : vector<8x16xf32>
    %cst_49 = arith.constant 0xFF800000 : f32
    %158 = vector.broadcast %cst_49 : f32 to vector<8x16xf32>
    %159 = arith.select %157, %158, %148 : vector<8x16xi1>, vector<8x16xf32>
    %cst_50 = arith.constant dense<0xFF800000> : vector<8xf32>
    %160 = vector.multi_reduction <maximumf>, %159, %cst_50 [1] : vector<8x16xf32> to vector<8xf32>
    %161 = vector.shape_cast %160 : vector<8xf32> to vector<8x1xf32>
    %162 = vector.broadcast %161 : vector<8x1xf32> to vector<8x16xf32>
    %163 = arith.cmpf oge, %159, %162 : vector<8x16xf32>
    %164 = arith.extui %163 : vector<8x16xi1> to vector<8x16xi32>
    %165 = arith.sitofp %164 : vector<8x16xi32> to vector<8x16xf32>
    %166 = arith.maximumf %155, %165 : vector<8x16xf32>
    %cst_51 = arith.constant 0.000000e+00 : f32
    %167 = vector.broadcast %cst_51 : f32 to vector<8x16xf32>
    %168 = arith.cmpf ogt, %165, %167 : vector<8x16xf32>
    %cst_52 = arith.constant 0xFF800000 : f32
    %169 = vector.broadcast %cst_52 : f32 to vector<8x16xf32>
    %170 = arith.select %168, %169, %159 : vector<8x16xi1>, vector<8x16xf32>
    %cst_53 = arith.constant dense<0xFF800000> : vector<8xf32>
    %171 = vector.multi_reduction <maximumf>, %170, %cst_53 [1] : vector<8x16xf32> to vector<8xf32>
    %172 = vector.shape_cast %171 : vector<8xf32> to vector<8x1xf32>
    %173 = vector.broadcast %172 : vector<8x1xf32> to vector<8x16xf32>
    %174 = arith.cmpf oge, %170, %173 : vector<8x16xf32>
    %175 = arith.extui %174 : vector<8x16xi1> to vector<8x16xi32>
    %176 = arith.sitofp %175 : vector<8x16xi32> to vector<8x16xf32>
    %177 = arith.maximumf %166, %176 : vector<8x16xf32>
    %178 = arith.mulf %177, %125 : vector<8x16xf32>
    %179 = math.absf %178 : vector<8x16xf32>
    %cst_54 = arith.constant dense<0.000000e+00> : vector<8xf32>
    %180 = vector.multi_reduction <add>, %179, %cst_54 [1] : vector<8x16xf32> to vector<8xf32>
    %181 = vector.shape_cast %180 : vector<8xf32> to vector<8x1xf32>
    %cst_55 = arith.constant 9.99999996E-13 : f32
    %182 = vector.broadcast %cst_55 : f32 to vector<8x1xf32>
    %183 = arith.maximumf %181, %182 : vector<8x1xf32>
    %cst_56 = arith.constant 1.000000e+00 : f32
    %184 = vector.broadcast %cst_56 : f32 to vector<8x1xf32>
    %185 = arith.divf %184, %183 : vector<8x1xf32>
    %186 = vector.broadcast %185 : vector<8x1xf32> to vector<8x16xf32>
    %187 = arith.mulf %178, %186 : vector<8x16xf32>
    %188 = math.absf %187 : vector<8x16xf32>
    %cst_57 = arith.constant dense<0.000000e+00> : vector<16xf32>
    %189 = vector.multi_reduction <add>, %188, %cst_57 [0] : vector<8x16xf32> to vector<16xf32>
    %190 = vector.shape_cast %189 : vector<16xf32> to vector<1x16xf32>
    %cst_58 = arith.constant 9.99999996E-13 : f32
    %191 = vector.broadcast %cst_58 : f32 to vector<1x16xf32>
    %192 = arith.maximumf %190, %191 : vector<1x16xf32>
    %cst_59 = arith.constant 1.000000e+00 : f32
    %193 = vector.broadcast %cst_59 : f32 to vector<1x16xf32>
    %194 = arith.divf %193, %192 : vector<1x16xf32>
    %195 = vector.broadcast %194 : vector<1x16xf32> to vector<8x16xf32>
    %196 = arith.mulf %187, %195 : vector<8x16xf32>
    %cst_60 = arith.constant dense<0.000000e+00> : vector<16x128xf32>
    %197 = tpu.matmul %196, %0, %cst_60 {dimension_numbers = #tpu.dot_dimension_numbers<[0], [0], [1], [1], [0, 1, 1, 1], [], []>} : vector<8x16xf32>, vector<8x128xf32>, vector<16x128xf32> -> vector<16x128xf32>
    %c0_61 = arith.constant 0 : index
    %c0_62 = arith.constant 0 : index
    %198 = vector.load %arg3[%c0_61, %c0_62] : memref<16x128xf32, #tpu.memory_space<vmem>>, vector<16x128xf32>
    %cst_63 = arith.constant dense<0.000000e+00> : vector<16x128xf32>
    %199 = tpu.matmul %196, %1, %cst_63 {dimension_numbers = #tpu.dot_dimension_numbers<[0], [0], [1], [1], [0, 1, 1, 1], [], []>} : vector<8x16xf32>, vector<8x128xf32>, vector<16x128xf32> -> vector<16x128xf32>
    %200 = arith.addf %198, %199 : vector<16x128xf32>
    %c0_64 = arith.constant 0 : index
    %c0_65 = arith.constant 0 : index
    %201 = vector.load %arg6[%c0_64, %c0_65] : memref<16x128xf32, #tpu.memory_space<vmem>>, vector<16x128xf32>
    tpu.vector_store %arg6[%c0_64, %c0_65], %200 {strides = array<i32>} : memref<16x128xf32, #tpu.memory_space<vmem>>, vector<16x128xf32>,
    %cst_66 = arith.constant 9.900000e-01 : f32
    %202 = vector.broadcast %cst_66 : f32 to vector<16x128xf32>
    %203 = arith.mulf %202, %2 : vector<16x128xf32>
    %cst_67 = arith.constant 0.00999999977 : f32
    %204 = vector.broadcast %cst_67 : f32 to vector<16x128xf32>
    %205 = arith.mulf %204, %197 : vector<16x128xf32>
    %206 = arith.addf %203, %205 : vector<16x128xf32>
    %207 = arith.mulf %206, %206 : vector<16x128xf32>
    %cst_68 = arith.constant dense<0.000000e+00> : vector<16xf32>
    %208 = vector.multi_reduction <add>, %207, %cst_68 [1] : vector<16x128xf32> to vector<16xf32>
    %209 = vector.shape_cast %208 : vector<16xf32> to vector<16x1xf32>
    %210 = math.sqrt %209 : vector<16x1xf32>
    %cst_69 = arith.constant 9.99999996E-13 : f32
    %211 = vector.broadcast %cst_69 : f32 to vector<16x1xf32>
    %212 = arith.maximumf %210, %211 : vector<16x1xf32>
    %cst_70 = arith.constant 1.000000e+00 : f32
    %213 = vector.broadcast %cst_70 : f32 to vector<16x1xf32>
    %214 = arith.divf %213, %212 : vector<16x1xf32>
    %215 = vector.broadcast %214 : vector<16x1xf32> to vector<16x128xf32>
    %216 = arith.mulf %206, %215 : vector<16x128xf32>
    %c0_71 = arith.constant 0 : index
    %c0_72 = arith.constant 0 : index
    %217 = vector.load %arg5[%c0_71, %c0_72] : memref<16x128xf32, #tpu.memory_space<vmem>>, vector<16x128xf32>
    tpu.vector_store %arg5[%c0_71, %c0_72], %216 {strides = array<i32>} : memref<16x128xf32, #tpu.memory_space<vmem>>, vector<16x128xf32>,
    %cst_73 = arith.constant dense<0.000000e+00> : vector<8x16xf32>
    %218 = tpu.matmul %0, %216, %cst_73 {dimension_numbers = #tpu.dot_dimension_numbers<[1], [1], [0], [0], [0, 0, 1, 0], [], []>, precision = #tpu.contract_precision<fp32>} : vector<8x128xf32>, vector<16x128xf32>, vector<8x16xf32> -> vector<8x16xf32>
    %cst_74 = arith.constant 1.000000e+01 : f32
    %219 = vector.broadcast %cst_74 : f32 to vector<8x16xf32>
    %220 = arith.mulf %218, %219 : vector<8x16xf32>
    %221 = vector.shape_cast %220 : vector<8x16xf32> to vector<1x8x16xf32>
    %cst_75 = arith.constant dense<0xFF800000> : vector<1xf32>
    %222 = vector.multi_reduction <maximumf>, %221, %cst_75 [1, 2] : vector<1x8x16xf32> to vector<1xf32>
    %223 = vector.shape_cast %222 : vector<1xf32> to vector<1x1x1xf32>
    %224 = vector.extract %223[0, 0, 0] : f32 from vector<1x1x1xf32>
    %225 = vector.broadcast %224 : f32 to vector<1x1xf32>
    %226 = vector.broadcast %225 : vector<1x1xf32> to vector<8x16xf32>
    %227 = arith.subf %220, %226 : vector<8x16xf32>
    %228 = math.exp %227 : vector<8x16xf32>
    %229 = arith.mulf %228, %228 : vector<8x16xf32>
    %230 = vector.shape_cast %229 : vector<8x16xf32> to vector<1x8x16xf32>
    %cst_76 = arith.constant dense<0.000000e+00> : vector<1xf32>
    %231 = vector.multi_reduction <add>, %230, %cst_76 [1, 2] : vector<1x8x16xf32> to vector<1xf32>
    %232 = vector.shape_cast %231 : vector<1xf32> to vector<1x1x1xf32>
    %233 = vector.extract %232[0, 0, 0] : f32 from vector<1x1x1xf32>
    %234 = vector.broadcast %233 : f32 to vector<1x1xf32>
    %cst_77 = arith.constant 1.000000e+00 : f32
    %235 = vector.broadcast %cst_77 : f32 to vector<1x1xf32>
    %236 = arith.divf %235, %234 : vector<1x1xf32>
    %237 = vector.broadcast %236 : vector<1x1xf32> to vector<8x16xf32>
    %238 = arith.mulf %229, %237 : vector<8x16xf32>
    %239 = math.absf %238 : vector<8x16xf32>
    %cst_78 = arith.constant dense<0.000000e+00> : vector<16xf32>
    %240 = vector.multi_reduction <add>, %239, %cst_78 [0] : vector<8x16xf32> to vector<16xf32>
    %241 = vector.shape_cast %240 : vector<16xf32> to vector<1x16xf32>
    %cst_79 = arith.constant 9.99999996E-13 : f32
    %242 = vector.broadcast %cst_79 : f32 to vector<1x16xf32>
    %243 = arith.maximumf %241, %242 : vector<1x16xf32>
    %cst_80 = arith.constant 1.000000e+00 : f32
    %244 = vector.broadcast %cst_80 : f32 to vector<1x16xf32>
    %245 = arith.divf %244, %243 : vector<1x16xf32>
    %246 = vector.broadcast %245 : vector<1x16xf32> to vector<8x16xf32>
    %247 = arith.mulf %238, %246 : vector<8x16xf32>
    %cst_81 = arith.constant 6.250000e-02 : f32
    %248 = vector.broadcast %cst_81 : f32 to vector<8x16xf32>
    %249 = arith.mulf %247, %248 : vector<8x16xf32>
    %250 = math.absf %249 : vector<8x16xf32>
    %cst_82 = arith.constant dense<0.000000e+00> : vector<8xf32>
    %251 = vector.multi_reduction <add>, %250, %cst_82 [1] : vector<8x16xf32> to vector<8xf32>
    %252 = vector.shape_cast %251 : vector<8xf32> to vector<8x1xf32>
    %cst_83 = arith.constant 9.99999996E-13 : f32
    %253 = vector.broadcast %cst_83 : f32 to vector<8x1xf32>
    %254 = arith.maximumf %252, %253 : vector<8x1xf32>
    %cst_84 = arith.constant 1.000000e+00 : f32
    %255 = vector.broadcast %cst_84 : f32 to vector<8x1xf32>
    %256 = arith.divf %255, %254 : vector<8x1xf32>
    %257 = vector.broadcast %256 : vector<8x1xf32> to vector<8x16xf32>
    %258 = arith.mulf %249, %257 : vector<8x16xf32>
    %cst_85 = arith.constant 1.250000e-01 : f32
    %259 = vector.broadcast %cst_85 : f32 to vector<8x16xf32>
    %260 = arith.mulf %258, %259 : vector<8x16xf32>
    %261 = math.absf %260 : vector<8x16xf32>
    %cst_86 = arith.constant dense<0.000000e+00> : vector<16xf32>
    %262 = vector.multi_reduction <add>, %261, %cst_86 [0] : vector<8x16xf32> to vector<16xf32>
    %263 = vector.shape_cast %262 : vector<16xf32> to vector<1x16xf32>
    %cst_87 = arith.constant 9.99999996E-13 : f32
    %264 = vector.broadcast %cst_87 : f32 to vector<1x16xf32>
    %265 = arith.maximumf %263, %264 : vector<1x16xf32>
    %cst_88 = arith.constant 1.000000e+00 : f32
    %266 = vector.broadcast %cst_88 : f32 to vector<1x16xf32>
    %267 = arith.divf %266, %265 : vector<1x16xf32>
    %268 = vector.broadcast %267 : vector<1x16xf32> to vector<8x16xf32>
    %269 = arith.mulf %260, %268 : vector<8x16xf32>
    %cst_89 = arith.constant 6.250000e-02 : f32
    %270 = vector.broadcast %cst_89 : f32 to vector<8x16xf32>
    %271 = arith.mulf %269, %270 : vector<8x16xf32>
    %272 = math.absf %271 : vector<8x16xf32>
    %cst_90 = arith.constant dense<0.000000e+00> : vector<8xf32>
    %273 = vector.multi_reduction <add>, %272, %cst_90 [1] : vector<8x16xf32> to vector<8xf32>
    %274 = vector.shape_cast %273 : vector<8xf32> to vector<8x1xf32>
    %cst_91 = arith.constant 9.99999996E-13 : f32
    %275 = vector.broadcast %cst_91 : f32 to vector<8x1xf32>
    %276 = arith.maximumf %274, %275 : vector<8x1xf32>
    %cst_92 = arith.constant 1.000000e+00 : f32
    %277 = vector.broadcast %cst_92 : f32 to vector<8x1xf32>
    %278 = arith.divf %277, %276 : vector<8x1xf32>
    %279 = vector.broadcast %278 : vector<8x1xf32> to vector<8x16xf32>
    %280 = arith.mulf %271, %279 : vector<8x16xf32>
    %cst_93 = arith.constant 1.250000e-01 : f32
    %281 = vector.broadcast %cst_93 : f32 to vector<8x16xf32>
    %282 = arith.mulf %280, %281 : vector<8x16xf32>
    %283 = math.absf %282 : vector<8x16xf32>
    %cst_94 = arith.constant dense<0.000000e+00> : vector<16xf32>
    %284 = vector.multi_reduction <add>, %283, %cst_94 [0] : vector<8x16xf32> to vector<16xf32>
    %285 = vector.shape_cast %284 : vector<16xf32> to vector<1x16xf32>
    %cst_95 = arith.constant 9.99999996E-13 : f32
    %286 = vector.broadcast %cst_95 : f32 to vector<1x16xf32>
    %287 = arith.maximumf %285, %286 : vector<1x16xf32>
    %cst_96 = arith.constant 1.000000e+00 : f32
    %288 = vector.broadcast %cst_96 : f32 to vector<1x16xf32>
    %289 = arith.divf %288, %287 : vector<1x16xf32>
    %290 = vector.broadcast %289 : vector<1x16xf32> to vector<8x16xf32>
    %291 = arith.mulf %282, %290 : vector<8x16xf32>
    %cst_97 = arith.constant 6.250000e-02 : f32
    %292 = vector.broadcast %cst_97 : f32 to vector<8x16xf32>
    %293 = arith.mulf %291, %292 : vector<8x16xf32>
    %294 = math.absf %293 : vector<8x16xf32>
    %cst_98 = arith.constant dense<0.000000e+00> : vector<8xf32>
    %295 = vector.multi_reduction <add>, %294, %cst_98 [1] : vector<8x16xf32> to vector<8xf32>
    %296 = vector.shape_cast %295 : vector<8xf32> to vector<8x1xf32>
    %cst_99 = arith.constant 9.99999996E-13 : f32
    %297 = vector.broadcast %cst_99 : f32 to vector<8x1xf32>
    %298 = arith.maximumf %296, %297 : vector<8x1xf32>
    %cst_100 = arith.constant 1.000000e+00 : f32
    %299 = vector.broadcast %cst_100 : f32 to vector<8x1xf32>
    %300 = arith.divf %299, %298 : vector<8x1xf32>
    %301 = vector.broadcast %300 : vector<8x1xf32> to vector<8x16xf32>
    %302 = arith.mulf %293, %301 : vector<8x16xf32>
    %cst_101 = arith.constant 1.250000e-01 : f32
    %303 = vector.broadcast %cst_101 : f32 to vector<8x16xf32>
    %304 = arith.mulf %302, %303 : vector<8x16xf32>
    %cst_102 = arith.constant 8.000000e+00 : f32
    %305 = vector.broadcast %cst_102 : f32 to vector<8x16xf32>
    %306 = arith.mulf %304, %305 : vector<8x16xf32>
    %cst_103 = arith.constant 0.000000e+00 : f32
    %307 = vector.broadcast %cst_103 : f32 to vector<8x16xf32>
    %308 = arith.cmpf ogt, %196, %307 : vector<8x16xf32>
    %309 = arith.extui %308 : vector<8x16xi1> to vector<8x16xi32>
    %310 = arith.sitofp %309 : vector<8x16xi32> to vector<8x16xf32>
    %311 = arith.mulf %36, %306 : vector<8x16xf32>
    %312 = arith.mulf %310, %311 : vector<8x16xf32>
    %313 = math.absf %312 : vector<8x16xf32>
    %cst_104 = arith.constant dense<0.000000e+00> : vector<8xf32>
    %314 = vector.multi_reduction <add>, %313, %cst_104 [1] : vector<8x16xf32> to vector<8xf32>
    %315 = vector.shape_cast %314 : vector<8xf32> to vector<8x1xf32>
    %cst_105 = arith.constant 9.99999996E-13 : f32
    %316 = vector.broadcast %cst_105 : f32 to vector<8x1xf32>
    %317 = arith.maximumf %315, %316 : vector<8x1xf32>
    %cst_106 = arith.constant 1.000000e+00 : f32
    %318 = vector.broadcast %cst_106 : f32 to vector<8x1xf32>
    %319 = arith.divf %318, %317 : vector<8x1xf32>
    %320 = vector.broadcast %319 : vector<8x1xf32> to vector<8x16xf32>
    %321 = arith.mulf %312, %320 : vector<8x16xf32>
    %322 = arith.mulf %321, %220 : vector<8x16xf32>
    %cst_107 = arith.constant dense<0.000000e+00> : vector<8xf32>
    %323 = vector.multi_reduction <add>, %322, %cst_107 [1] : vector<8x16xf32> to vector<8xf32>
    %324 = vector.shape_cast %323 : vector<8xf32> to vector<8x1xf32>
    %cst_108 = arith.constant dense<0.000000e+00> : vector<8xf32>
    %325 = vector.multi_reduction <add>, %228, %cst_108 [1] : vector<8x16xf32> to vector<8xf32>
    %326 = vector.shape_cast %325 : vector<8xf32> to vector<8x1xf32>
    %327 = math.log %326 : vector<8x1xf32>
    %328 = vector.broadcast %225 : vector<1x1xf32> to vector<8x1xf32>
    %329 = arith.addf %328, %327 : vector<8x1xf32>
    %330 = vector.shape_cast %324 : vector<8x1xf32> to vector<1x8x1xf32>
    %cst_109 = arith.constant dense<0.000000e+00> : vector<1xf32>
    %331 = vector.multi_reduction <add>, %330, %cst_109 [1, 2] : vector<1x8x1xf32> to vector<1xf32>
    %332 = vector.shape_cast %331 : vector<1xf32> to vector<1x1x1xf32>
    %333 = vector.extract %332[0, 0, 0] : f32 from vector<1x1x1xf32>
    %334 = vector.broadcast %333 : f32 to vector<1x1xf32>
    %335 = vector.shape_cast %329 : vector<8x1xf32> to vector<1x8x1xf32>
    %cst_110 = arith.constant dense<0.000000e+00> : vector<1xf32>
    %336 = vector.multi_reduction <add>, %335, %cst_110 [1, 2] : vector<1x8x1xf32> to vector<1xf32>
    %337 = vector.shape_cast %336 : vector<1xf32> to vector<1x1x1xf32>
    %338 = vector.extract %337[0, 0, 0] : f32 from vector<1x1x1xf32>
    %339 = vector.broadcast %338 : f32 to vector<1x1xf32>
    %340 = arith.subf %334, %339 : vector<1x1xf32>
    %cst_111 = arith.constant 0.000000e+00 : f32
    %341 = vector.broadcast %cst_111 : f32 to vector<1x1xf32>
    %342 = arith.subf %341, %340 : vector<1x1xf32>
    %cst_112 = arith.constant 1.250000e-01 : f32
    %343 = vector.broadcast %cst_112 : f32 to vector<1x1xf32>
    %344 = arith.mulf %342, %343 : vector<1x1xf32>
    %345 = tpu.iota {dimensions = array<i32: 0>} : vector<16x16xi32>
    %346 = tpu.iota {dimensions = array<i32: 1>} : vector<16x16xi32>
    %347 = arith.cmpi ne, %345, %346 : vector<16x16xi32>
    %348 = arith.extui %347 : vector<16x16xi1> to vector<16x16xi32>
    %349 = arith.sitofp %348 : vector<16x16xi32> to vector<16x16xf32>
    %c2_i32_113 = arith.constant 2 : i32
    %c0_i32_114 = arith.constant 0 : i32
    %350 = arith.cmpi eq, %c2_i32_113, %c0_i32_114 : i32
    %c1_i32_115 = arith.constant 1 : i32
    %351 = arith.select %350, %c1_i32_115, %c2_i32_113 : i32
    %352 = vector.broadcast %351 : i32 to vector<16x16xi32>
    %353 = arith.remsi %345, %352 : vector<16x16xi32>
    %c0_i32_116 = arith.constant 0 : i32
    %354 = vector.broadcast %c0_i32_116 : i32 to vector<16x16xi32>
    %355 = arith.cmpi ne, %353, %354 : vector<16x16xi32>
    %c0_i32_117 = arith.constant 0 : i32
    %356 = vector.broadcast %c0_i32_117 : i32 to vector<16x16xi32>
    %357 = arith.cmpi slt, %353, %356 : vector<16x16xi32>
    %c0_i32_118 = arith.constant 0 : i32
    %358 = arith.cmpi slt, %351, %c0_i32_118 : i32
    %359 = vector.broadcast %358 : i1 to vector<16x16xi1>
    %360 = vector.broadcast %359 : vector<16x16xi1> to vector<16x16xi1>
    %361 = arith.xori %357, %360 : vector<16x16xi1>
    %362 = arith.andi %361, %355 : vector<16x16xi1>
    %363 = vector.broadcast %351 : i32 to vector<16x16xi32>
    %364 = arith.addi %353, %363 : vector<16x16xi32>
    %365 = arith.select %362, %364, %353 : vector<16x16xi1>, vector<16x16xi32>
    %c2_i32_119 = arith.constant 2 : i32
    %c0_i32_120 = arith.constant 0 : i32
    %366 = arith.cmpi eq, %c2_i32_119, %c0_i32_120 : i32
    %c1_i32_121 = arith.constant 1 : i32
    %367 = arith.select %366, %c1_i32_121, %c2_i32_119 : i32
    %368 = vector.broadcast %367 : i32 to vector<16x16xi32>
    %369 = arith.remsi %346, %368 : vector<16x16xi32>
    %c0_i32_122 = arith.constant 0 : i32
    %370 = vector.broadcast %c0_i32_122 : i32 to vector<16x16xi32>
    %371 = arith.cmpi ne, %369, %370 : vector<16x16xi32>
    %c0_i32_123 = arith.constant 0 : i32
    %372 = vector.broadcast %c0_i32_123 : i32 to vector<16x16xi32>
    %373 = arith.cmpi slt, %369, %372 : vector<16x16xi32>
    %c0_i32_124 = arith.constant 0 : i32
    %374 = arith.cmpi slt, %367, %c0_i32_124 : i32
    %375 = vector.broadcast %374 : i1 to vector<16x16xi1>
    %376 = vector.broadcast %375 : vector<16x16xi1> to vector<16x16xi1>
    %377 = arith.xori %373, %376 : vector<16x16xi1>
    %378 = arith.andi %377, %371 : vector<16x16xi1>
    %379 = vector.broadcast %367 : i32 to vector<16x16xi32>
    %380 = arith.addi %369, %379 : vector<16x16xi32>
    %381 = arith.select %378, %380, %369 : vector<16x16xi1>, vector<16x16xi32>
    %382 = arith.cmpi eq, %365, %381 : vector<16x16xi32>
    %383 = arith.extui %382 : vector<16x16xi1> to vector<16x16xi32>
    %384 = arith.sitofp %383 : vector<16x16xi32> to vector<16x16xf32>
    %385 = arith.mulf %384, %349 : vector<16x16xf32>
    %cst_125 = arith.constant 0.142857149 : f32
    %386 = vector.broadcast %cst_125 : f32 to vector<16x16xf32>
    %387 = arith.mulf %385, %386 : vector<16x16xf32>
    %cst_126 = arith.constant dense<0.000000e+00> : vector<16x16xf32>
    %388 = tpu.matmul %216, %216, %cst_126 {dimension_numbers = #tpu.dot_dimension_numbers<[1], [1], [0], [0], [0, 0, 1, 0], [], []>, precision = #tpu.contract_precision<fp32>} : vector<16x128xf32>, vector<16x128xf32>, vector<16x16xf32> -> vector<16x16xf32>
    %cst_127 = arith.constant 2.000000e+00 : f32
    %389 = vector.broadcast %cst_127 : f32 to vector<16x16xf32>
    %390 = arith.mulf %388, %389 : vector<16x16xf32>
    %cst_128 = arith.constant dense<0xFF800000> : vector<16xf32>
    %391 = vector.multi_reduction <maximumf>, %390, %cst_128 [1] : vector<16x16xf32> to vector<16xf32>
    %392 = vector.shape_cast %391 : vector<16xf32> to vector<16x1xf32>
    %393 = vector.broadcast %392 : vector<16x1xf32> to vector<16x16xf32>
    %394 = arith.subf %390, %393 : vector<16x16xf32>
    %395 = arith.mulf %387, %394 : vector<16x16xf32>
    %cst_129 = arith.constant dense<0.000000e+00> : vector<16xf32>
    %396 = vector.multi_reduction <add>, %395, %cst_129 [1] : vector<16x16xf32> to vector<16xf32>
    %397 = vector.shape_cast %396 : vector<16xf32> to vector<16x1xf32>
    %398 = math.exp %394 : vector<16x16xf32>
    %399 = arith.mulf %349, %398 : vector<16x16xf32>
    %cst_130 = arith.constant dense<0.000000e+00> : vector<16xf32>
    %400 = vector.multi_reduction <add>, %399, %cst_130 [1] : vector<16x16xf32> to vector<16xf32>
    %401 = vector.shape_cast %400 : vector<16xf32> to vector<16x1xf32>
    %402 = math.log %401 : vector<16x1xf32>
    %403 = arith.subf %397, %402 : vector<16x1xf32>
    %404 = vector.shape_cast %403 : vector<16x1xf32> to vector<1x16x1xf32>
    %cst_131 = arith.constant dense<0.000000e+00> : vector<1xf32>
    %405 = vector.multi_reduction <add>, %404, %cst_131 [1, 2] : vector<1x16x1xf32> to vector<1xf32>
    %406 = vector.shape_cast %405 : vector<1xf32> to vector<1x1x1xf32>
    %407 = vector.extract %406[0, 0, 0] : f32 from vector<1x1x1xf32>
    %408 = vector.broadcast %407 : f32 to vector<1x1xf32>
    %cst_132 = arith.constant 0.000000e+00 : f32
    %409 = vector.broadcast %cst_132 : f32 to vector<1x1xf32>
    %410 = arith.subf %409, %408 : vector<1x1xf32>
    %cst_133 = arith.constant 6.250000e-02 : f32
    %411 = vector.broadcast %cst_133 : f32 to vector<1x1xf32>
    %412 = arith.mulf %410, %411 : vector<1x1xf32>
    %cst_134 = arith.constant 1.000000e+00 : f32
    %413 = vector.broadcast %cst_134 : f32 to vector<1x1xf32>
    %414 = arith.mulf %413, %412 : vector<1x1xf32>
    %415 = arith.addf %344, %414 : vector<1x1xf32>
    %416 = tpu.iota {dimensions = array<i32: 1>} : vector<1x128xi32>
    %cst_135 = arith.constant 0.000000e+00 : f32
    %417 = vector.broadcast %cst_135 : f32 to vector<1x128xf32>
    %c0_i32_136 = arith.constant 0 : i32
    %418 = vector.broadcast %c0_i32_136 : i32 to vector<1x128xi32>
    %419 = arith.cmpi eq, %416, %418 : vector<1x128xi32>
    %420 = vector.shape_cast %415 : vector<1x1xf32> to vector<1x1xf32>
    %421 = vector.broadcast %420 : vector<1x1xf32> to vector<1x128xf32>
    %422 = arith.select %419, %421, %417 : vector<1x128xi1>, vector<1x128xf32>
    %c1_i32_137 = arith.constant 1 : i32
    %423 = vector.broadcast %c1_i32_137 : i32 to vector<1x128xi32>
    %424 = arith.cmpi eq, %416, %423 : vector<1x128xi32>
    %425 = vector.shape_cast %344 : vector<1x1xf32> to vector<1x1xf32>
    %426 = vector.broadcast %425 : vector<1x1xf32> to vector<1x128xf32>
    %427 = arith.select %424, %426, %417 : vector<1x128xi1>, vector<1x128xf32>
    %428 = arith.addf %422, %427 : vector<1x128xf32>
    %c2_i32_138 = arith.constant 2 : i32
    %429 = vector.broadcast %c2_i32_138 : i32 to vector<1x128xi32>
    %430 = arith.cmpi eq, %416, %429 : vector<1x128xi32>
    %431 = vector.shape_cast %414 : vector<1x1xf32> to vector<1x1xf32>
    %432 = vector.broadcast %431 : vector<1x1xf32> to vector<1x128xf32>
    %433 = arith.select %430, %432, %417 : vector<1x128xi1>, vector<1x128xf32>
    %434 = arith.addf %428, %433 : vector<1x128xf32>
    %c0_139 = arith.constant 0 : index
    %c0_140 = arith.constant 0 : index
    %435 = vector.load %arg4[%c0_139, %c0_140] : memref<1x128xf32, #tpu.memory_space<vmem>>, vector<1x128xf32>
    tpu.vector_store %arg4[%c0_139, %c0_140], %434 {strides = array<i32>} : memref<1x128xf32, #tpu.memory_space<vmem>>, vector<1x128xf32>,
    return
  }
}

</mosaic_0001>

<bundles_post_ra>
// kernel: _palm_forward_impl.1
= control target key start
LH: loop header
LB: loop body
LE: loop exit
PB: predicated region body
PF: predicated region fallthrough
CT: control target
= control target key end

     0   :  { %12 = vsyncpa [#allocation3], 0  ;;  %s1871_s0 = inlined_call_operand.vmem [shape: f32[8,128], index: 0, kind: input, shape index: {}]   ;;  %s1872_s1 = inlined_call_operand.vmem [shape: f32[8,128], index: 1, kind: input, shape index: {}]   ;;  %s1873_s2 = inlined_call_operand.hbm [shape: f32[16,128], index: 2, kind: input, shape index: {}, may-alias: {2,5}]   ;;  %s1874_s3 = inlined_call_operand.hbm [shape: f32[16,128], index: 3, kind: input, shape index: {}, may-alias: {3,6}]   ;;  %s1875_s4 = inlined_call_operand.vmem [shape: f32[1,128], index: 4, kind: output, shape index: {0}]   ;;  %s1876_s5 = inlined_call_operand.hbm [shape: f32[16,128], index: 5, kind: output, shape index: {1}, may-alias: {2,5}]   ;;  %s1877_s6 = inlined_call_operand.hbm [shape: f32[16,128], index: 6, kind: output, shape index: {2}, may-alias: {3,6}]  }
   0x1   :  { %13 = vsyncpa [#allocation6], 0 }
   0x2   :  { %14 = vsyncpa [#allocation4], 0 }
   0x3   :  { %15 = vsyncpa [#allocation9], 0  ;;  %s24_s23 = sshll.u32 %s1873_s2, 4  ;;  %s1638_s24 = smov [#allocation2]   ;;  %s25_s23 = int_to_ptr.hbm [resolvable:$true] %s24_s23 }
   0x4   :  { %s26_s25 = sshll.u32 %s1638_s24, 4  ;;  %s37_s28 = sshll.u32 %s1874_s3, 4  ;;  %s27_s25 = int_to_ptr.vmem [resolvable:$true] %s26_s25  ;;  %s38_s28 = int_to_ptr.hbm [resolvable:$true] %s37_s28 }
   0x5   :  { %s1639_s29 = smov 128   ;;  %s1640_s30 = smov 8  }
   0x6   :  { %32 = dma.hbm_to_vmem [thread:$0]  %s25_s23, 256, %s27_s25, [#allocation3], %s1639_s29, %s1639_s29, %s1640_s30  }
   0x7   :  { %s1641_s7 = smov [#allocation5]  }
   0x8   :  { %s39_s8 = sshll.u32 %s1641_s7, 4  ;;  %s40_s8 = int_to_ptr.vmem [resolvable:$true] %s39_s8 }
   0x9   :  { %45 = dma.hbm_to_vmem [thread:$0]  %s38_s28, 256, %s40_s8, [#allocation6], %s1639_s29, %s1639_s29, %s1640_s30  }
   0xa   :  { %1630 = dma.done.wait [#allocation3], 256  }
   0xb   :  { %1631 = vsyncadd [#allocation3], 4294967040 }
   0xc   :  { %1632 = dma.done.wait [#allocation6], 256  }
   0xd   :  { %1633 = vsyncadd [#allocation6], 4294967040  ;;  %v1694_v0 = vld [vmem:[#allocation2 + $0x8] sm:$0xff]  ;;  %v1696_v1 = vld [vmem:[#allocation2] sm:$0xff]  ;;  %vm250_vm0 = vcmask 130048   ;;  %s1645_s13 = smov [#allocation7]  }
   0xe   :  { %v54_v2 = vld [vmem:[%s1871_s0] sm:$0xff]  ;;  %v105_v3 = vand.u32 4294901760, %v1694_v0  ;;  %v107_v4 = vand.u32 4294901760, %v1696_v1  ;;  %s1401_s14 = sshll.u32 %s1645_s13, 4  ;;  %s1403_s17 = sshll.u32 %s1876_s5, 4  ;;  %s1402_s14 = int_to_ptr.vmem [resolvable:$true] %s1401_s14  ;;  %s1404_s17 = int_to_ptr.hbm [resolvable:$true] %s1403_s17 }
   0xf   :  { %v1703_v5 = vand.u32 4294901760, %v54_v2  ;;  %s1646_s18 = smov [#allocation8]   ;;  %s1416_s22 = sshll.u32 %s1877_s6, 4  ;;  %s1417_s22 = int_to_ptr.hbm [resolvable:$true] %s1416_s22 }
  0x10   :  { %106 = vmatpush.xpose.msra.mxu2 %v105_v3  ;;  %v133_v6 = vsub.f32 %v1694_v0, %v105_v3  ;;  %v139_v8 = vsub.f32 %v1696_v1, %v107_v4  ;;  %242 = vmatpush.xpose.msra.mxu1 %v105_v3  ;;  %s1414_s19 = sshll.u32 %s1646_s18, 4  ;;  %s1415_s19 = int_to_ptr.vmem [resolvable:$true] %s1414_s19 }
  0x11   :  { %v1707_v7 = vsub.f32 %v54_v2, %v1703_v5 }
  0x12   :  { %v134_v9 = vand.u32 4294901760, %v133_v6  ;;  %v140_v11 = vand.u32 4294901760, %v139_v8 }
  0x13   :  { %v1711_v10 = vand.u32 4294901760, %v1707_v7 }
  0x14   :  { %108 = vmatpush.xpose.msra.mxu2 %v107_v4  ;;  %v135_v12 = vsub.f32 %v133_v6, %v134_v9  ;;  %v141_v14 = vsub.f32 %v139_v8, %v140_v11  ;;  %217 = vmatpush.xpose.msra.mxu0 %v134_v9 }
  0x15   :  { %v112_v13 = vsub.f32 %v1707_v7, %v1711_v10  ;;  %244 = vmatpush.xpose.msra.mxu1 %v107_v4 }
  0x16   :  { %v136_v15 = vand.u32 4294901760, %v135_v12  ;;  %v142_v17 = vand.u32 4294901760, %v141_v14 }
  0x17   :  { %v1715_v16 = vand.u32 4294901760, %v112_v13 }
  0x18   :  { %165 = vmatpush.xpose.msrb.mxu2 %v133_v6  ;;  %137 = vmatpush.xpose.msra.mxu3 %v136_v15 }
  0x19   :  { %114 = vmatmul.f32.vlgmr.msra.gmra.mxu2 %v1715_v16  ;;  %221 = vmatpush.xpose.msra.mxu0 %v140_v11 }
  0x1a   :  { %246 = vmatmul.f32.vlgmr.msra.gmra.mxu1 %v1703_v5 }
  0x1c   :  { %168 = vmatpush.xpose.msrb.mxu2 %v139_v8  ;;  %143 = vmatpush.xpose.msra.mxu3 %v142_v17 }
  0x1d   :  { %223 = vmatmul.f32.vlgmr.msra.gmra.mxu0 %v1703_v5 }
  0x1f   :  { %145 = vmatmul.f32.vlgmr.msra.gmra.mxu3 %v1703_v5 }
  0x20   :  { %583 = vmatpush.msra.mxu2 %v54_v2  ;;  %190 = vmatpush.xpose.msrb.mxu3 %v105_v3 }
  0x21   :  { %171 = vmatmul.f32.vlgmr.msrb.gmra.mxu2 %v1707_v7 }
  0x24   :  { %192 = vmatpush.xpose.msrb.mxu3 %v107_v4 }
  0x27   :  { %196 = vmatmul.f32.vlgmr.msrb.gmra.mxu3 %v1711_v10 }
  0x97   :  { %v247_v26 = vpop.f32.mrf.mxu1 }
  0x9a   :  { %v224_v24 = vpop.f32.mrf.mxu0 }
  0x9c   :  { %v115_v18 = vpop.f32.mrf.mxu2 }
  0xa2   :  { %v146_v19 = vpop.f32.mrf.mxu3 }
  0xa3   :  { %v147_v20 = vadd.f32 %v146_v19, %v115_v18 }
  0xa4   :  { %v172_v21 = vpop.f32.mrf.mxu2 }
  0xa5   :  { %v173_v22 = vadd.f32 %v172_v21, %v147_v20 }
  0xaa   :  { %v197_v23 = vpop.f32.mrf.mxu3 }
  0xab   :  { %v198_v25 = vadd.f32 %v197_v23, %v173_v22 }
  0xad   :  { %v225_v27 = vadd.f32 %v224_v24, %v198_v25 }
  0xaf   :  { %v248_v28 = vadd.f32 %v247_v26, %v225_v27 }
  0xb1   :  { %v251_v29 = vsel %vm250_vm0, %v248_v28, -inf }
  0xb2   :  { %252 = vmax.xlane.f32.xlu0 %v251_v29 }
 0x125   :  { %v253_v30 = vpop.xlane.xlu0 %252 }
 0x126   :  { %v254_v31 = vrot.slane %v253_v30, 4 }
 0x128   :  { %v255_v32 = vmax.f32 %v253_v30, %v254_v31 }
 0x12a   :  { %v256_v33 = vrot.slane %v255_v32, 2 }
 0x12c   :  { %v257_v34 = vmax.f32 %v255_v32, %v256_v33 }
 0x12e   :  { %v258_v35 = vrot.slane %v257_v34, 1 }
 0x130   :  { %v259_v36 = vmax.f32 %v257_v34, %v258_v35 }
 0x132   :  { %1453 = vpush %v259_v36 }
 0x163   :  { %s1454_s0 = spop %1453 }
 0x164   :  { %v261_v37 = vstv %s1454_s0 }
 0x165   :  { %v262_v38 = vsub.f32 %v248_v28, %v261_v37 }
 0x167   :  { %v263_v39 = vmul.f32 20.0, %v262_v38 }
 0x169   :  { %v264_v40 = vmul.f32 1.442695, %v263_v39 }
 0x16b   :  { %1478 = vpow2.f32 %v264_v40 }
 0x171   :  { %v1479_v41 = vpop.eup %1478 }
 0x172   :  { %v266_v42 = vsel %vm250_vm0, %v1479_v41, 0.0 }
 0x173   :  { %267 = vadd.xlane.f32.xlu0 %v266_v42 }
 0x1e6   :  { %v268_v43 = vpop.xlane.xlu0 %267 }
 0x1e7   :  { %v269_v44 = vrot.slane %v268_v43, 4 }
 0x1e9   :  { %v270_v45 = vadd.f32 %v269_v44, %v268_v43 }
 0x1eb   :  { %v271_v46 = vrot.slane %v270_v45, 2 }
 0x1ed   :  { %v272_v47 = vadd.f32 %v271_v46, %v270_v45 }
 0x1ef   :  { %v273_v48 = vrot.slane %v272_v47, 1 }
 0x1f1   :  { %v274_v49 = vadd.f32 %v273_v48, %v272_v47 }
 0x1f3   :  { %1455 = vpush %v274_v49 }
 0x224   :  { %s1456_s9 = spop %1455 }
 0x225   :  { %v276_v50 = vstv %s1456_s9 }
 0x226   :  { %1480 = vrcp.f32 %v276_v50  ;;  %v288_v54 = vand.u32 2147483648, %v276_v50  ;;  %v286_v56 = vand.u32 2147483647, %v276_v50  ;;  %vm282_vm2 = vweird.f32 %v276_v50 }
 0x228   :  { %v289_v58 = vor.u32 1.1754944e-38, %v288_v54  ;;  %vm287_vm4 = vcmp.eq.f32.partialorder %v286_v56, 8.507059e+37 }
 0x22c   :  { %v1481_v51 = vpop.eup %1480 }
 0x22d   :  { %v278_v52 = vmul.f32 %v1481_v51, %v276_v50  ;;  %vm283_vm1 = vweird.f32 %v1481_v51 }
 0x22e   :  { %vm284_vm3 = vmor %vm282_vm2, %vm283_vm1 }
 0x22f   :  { %v279_v53 = vsub.f32 1.0, %v278_v52 }
 0x231   :  { %v280_v55 = vmul.f32 %v1481_v51, %v279_v53 }
 0x233   :  { %v281_v57 = vadd.f32 %v1481_v51, %v280_v55 }
 0x235   :  { %v285_v59 = vsel %vm284_vm3, %v1481_v51, %v281_v57 }
 0x236   :  { %v290_v60 = vsel %vm287_vm4, %v289_v58, %v285_v59 }
 0x237   :  { %v292_v61 = vmul.f32 %v1479_v41, %v290_v60 }
 0x239   :  { %v293_v62 = vand.u32 2147483647, %v292_v61 }
 0x23b   :  { %v294_v63 = vsel %vm250_vm0, %v293_v62, 0.0 }
 0x23c   :  { %v295_v2 = vrot.slane %v294_v63, 4 }
 0x23e   :  { %v296_v3 = vadd.f32 %v295_v2, %v294_v63 }
 0x240   :  { %v297_v4 = vrot.slane %v296_v3, 2 }
 0x242   :  { %v298_v6 = vadd.f32 %v297_v4, %v296_v3 }
 0x244   :  { %v299_v8 = vrot.slane %v298_v6, 1 }
 0x246   :  { %v300_v9 = vadd.f32 %v299_v8, %v298_v6 }
 0x248   :  { %v301_v11 = vmax.f32 %v300_v9, 1e-12 }
 0x24a   :  { %1482 = vrcp.f32 %v301_v11  ;;  %v313_v15 = vand.u32 2147483648, %v301_v11  ;;  %v311_v18 = vand.u32 2147483647, %v301_v11  ;;  %vm307_vm6 = vweird.f32 %v301_v11 }
 0x24c   :  { %v314_v20 = vor.u32 1.1754944e-38, %v313_v15  ;;  %vm312_vm8 = vcmp.eq.f32.partialorder %v311_v18, 8.507059e+37 }
 0x250   :  { %v1483_v12 = vpop.eup %1482 }
 0x251   :  { %v303_v13 = vmul.f32 %v1483_v12, %v301_v11  ;;  %vm308_vm5 = vweird.f32 %v1483_v12 }
 0x252   :  { %vm309_vm7 = vmor %vm307_vm6, %vm308_vm5 }
 0x253   :  { %v304_v14 = vsub.f32 1.0, %v303_v13 }
 0x255   :  { %v305_v17 = vmul.f32 %v1483_v12, %v304_v14 }
 0x257   :  { %v306_v19 = vadd.f32 %v1483_v12, %v305_v17 }
 0x259   :  { %v310_v21 = vsel %vm309_vm7, %v1483_v12, %v306_v19 }
 0x25a   :  { %v315_v22 = vsel %vm312_vm8, %v314_v20, %v310_v21 }
 0x25b   :  { %v317_v23 = vmul.f32 %v315_v22, %v292_v61 }
 0x25d   :  { %v318_v24 = vmul.f32 0.0625, %v317_v23 }
 0x25f   :  { %v319_v25 = vand.u32 2147483647, %v318_v24 }
 0x261   :  { %v320_v26 = vsel %vm250_vm0, %v319_v25, 0.0 }
 0x262   :  { %321 = vadd.xlane.f32.xlu1 %v320_v26  ;;  %v55_v26 = vld [vmem:[%s1872_s1] sm:$0xff] }
 0x263   :  { %608 = vmatpush.msra.mxu3 %v55_v26 }
 0x2d5   :  { %v322_v27 = vpop.xlane.xlu1 %321 }
 0x2d6   :  { %v323_v28 = vmax.f32 %v322_v27, 1e-12  ;;  %v1642_v27 = vmov 1  }
 0x2d7   :  { %1477 = vset.pattern.permute.xlu0 %v1642_v27 }
 0x2d8   :  { %1484 = vrcp.f32 %v323_v28  ;;  %v335_v32 = vand.u32 2147483648, %v323_v28  ;;  %v333_v34 = vand.u32 2147483647, %v323_v28  ;;  %vm329_vm10 = vweird.f32 %v323_v28  ;;  %86 = vperm.xlu0 %1477, %v55_v26  }
 0x2da   :  { %v336_v36 = vor.u32 1.1754944e-38, %v335_v32  ;;  %vm334_vm12 = vcmp.eq.f32.partialorder %v333_v34, 8.507059e+37 }
 0x2de   :  { %v1485_v29 = vpop.eup %1484 }
 0x2df   :  { %v325_v30 = vmul.f32 %v1485_v29, %v323_v28  ;;  %vm330_vm9 = vweird.f32 %v1485_v29  ;;  %v1643_v28 = vmov 0  }
 0x2e0   :  { %vm331_vm11 = vmor %vm329_vm10, %vm330_vm9  ;;  %1476 = vset.pattern.permute.xlu2 %v1643_v28 }
 0x2e1   :  { %v326_v31 = vsub.f32 1.0, %v325_v30 }
 0x2e3   :  { %v327_v33 = vmul.f32 %v1485_v29, %v326_v31 }
 0x2e5   :  { %v328_v35 = vadd.f32 %v1485_v29, %v327_v33 }
 0x2e7   :  { %v332_v37 = vsel %vm331_vm11, %v1485_v29, %v328_v35 }
 0x2e8   :  { %v337_v38 = vsel %vm334_vm12, %v336_v36, %v332_v37 }
 0x2e9   :  { %v339_v39 = vmul.f32 %v337_v38, %v318_v24 }
 0x2eb   :  { %v340_v40 = vmul.f32 0.125, %v339_v39 }
 0x2ed   :  { %v341_v41 = vand.u32 2147483647, %v340_v40 }
 0x2ef   :  { %v342_v42 = vsel %vm250_vm0, %v341_v41, 0.0 }
 0x2f0   :  { %v343_v43 = vrot.slane %v342_v42, 4 }
 0x2f2   :  { %v344_v44 = vadd.f32 %v343_v43, %v342_v42 }
 0x2f4   :  { %v345_v45 = vrot.slane %v344_v44, 2 }
 0x2f6   :  { %v346_v46 = vadd.f32 %v345_v45, %v344_v44 }
 0x2f8   :  { %v347_v47 = vrot.slane %v346_v46, 1 }
 0x2fa   :  { %v348_v48 = vadd.f32 %v347_v47, %v346_v46  ;;  %v58_v47 = vlaneseq }
 0x2fc   :  { %v349_v49 = vmax.f32 %v348_v48, 1e-12 }
 0x2fe   :  { %1486 = vrcp.f32 %v349_v49  ;;  %v361_v53 = vand.u32 2147483648, %v349_v49  ;;  %v359_v55 = vand.u32 2147483647, %v349_v49  ;;  %vm355_vm14 = vweird.f32 %v349_v49 }
 0x300   :  { %v362_v57 = vor.u32 1.1754944e-38, %v361_v53  ;;  %vm360_vm1 = vcmp.eq.f32.partialorder %v359_v55, 8.507059e+37 }
 0x304   :  { %v1487_v50 = vpop.eup %1486 }
 0x305   :  { %v351_v51 = vmul.f32 %v1487_v50, %v349_v49  ;;  %vm356_vm13 = vweird.f32 %v1487_v50  ;;  %v1735_v49 = vand.u32 127, %v58_v47 }
 0x306   :  { %vm357_vm15 = vmor %vm355_vm14, %vm356_vm13 }
 0x307   :  { %v352_v52 = vsub.f32 1.0, %v351_v51 }
 0x309   :  { %v353_v54 = vmul.f32 %v1487_v50, %v352_v52 }
 0x30b   :  { %v354_v56 = vadd.f32 %v1487_v50, %v353_v54 }
 0x30d   :  { %v358_v58 = vsel %vm357_vm15, %v1487_v50, %v354_v56  ;;  %v1738_v50 = vand.u32 1, %v1735_v49 }
 0x30e   :  { %v363_v59 = vsel %vm360_vm1, %v362_v57, %v358_v58  ;;  %v1644_v57 = vmov 0.0  }
 0x30f   :  { %v365_v60 = vmul.f32 %v363_v59, %v340_v40  ;;  %vm72_vm10 = vcmp.eq.s32.totalorder %v1738_v50, 0  ;;  %vm82_vm11 = vcmp.eq.s32.totalorder %v1738_v50, 1 }
 0x310   :  { %v1437_v58 = vsel %vm72_vm10, 1.0, %v1644_v57 }
 0x311   :  { %v366_v61 = vmul.f32 0.0625, %v365_v60  ;;  %v1438_v60 = vsel %vm82_vm11, 1.0, %v1644_v57 }
 0x313   :  { %v367_v62 = vand.u32 2147483647, %v366_v61 }
 0x315   :  { %v368_v63 = vsel %vm250_vm0, %v367_v62, 0.0 }
 0x316   :  { %369 = vadd.xlane.f32.xlu1 %v368_v63 }
 0x389   :  { %v370_v2 = vpop.xlane.xlu1 %369 }
 0x38a   :  { %v371_v3 = vmax.f32 %v370_v2, 1e-12 }
 0x38c   :  { %1488 = vrcp.f32 %v371_v3  ;;  %v383_v9 = vand.u32 2147483648, %v371_v3  ;;  %v381_v12 = vand.u32 2147483647, %v371_v3  ;;  %vm377_vm3 = vweird.f32 %v371_v3 }
 0x38e   :  { %v384_v14 = vor.u32 1.1754944e-38, %v383_v9  ;;  %vm382_vm5 = vcmp.eq.f32.partialorder %v381_v12, 8.507059e+37 }
 0x392   :  { %v1489_v4 = vpop.eup %1488 }
 0x393   :  { %v373_v6 = vmul.f32 %v1489_v4, %v371_v3  ;;  %vm378_vm2 = vweird.f32 %v1489_v4 }
 0x394   :  { %vm379_vm4 = vmor %vm377_vm3, %vm378_vm2 }
 0x395   :  { %v374_v8 = vsub.f32 1.0, %v373_v6 }
 0x397   :  { %v375_v11 = vmul.f32 %v1489_v4, %v374_v8 }
 0x399   :  { %v376_v13 = vadd.f32 %v1489_v4, %v375_v11 }
 0x39b   :  { %v380_v15 = vsel %vm379_vm4, %v1489_v4, %v376_v13 }
 0x39c   :  { %v385_v17 = vsel %vm382_vm5, %v384_v14, %v380_v15 }
 0x39d   :  { %v387_v18 = vmul.f32 %v385_v17, %v366_v61  ;;  %v87_v61 = vpop.permute.xlu0 %86 }
 0x39e   :  { %v89_v4 = vmul.f32 %v1438_v60, %v87_v61 }
 0x39f   :  { %v388_v19 = vmul.f32 0.125, %v387_v18 }
 0x3a1   :  { %v389_v20 = vand.u32 2147483647, %v388_v19 }
 0x3a3   :  { %v390_v21 = vsel %vm250_vm0, %v389_v20, 0.0 }
 0x3a4   :  { %v391_v22 = vrot.slane %v390_v21, 4 }
 0x3a6   :  { %v392_v23 = vadd.f32 %v391_v22, %v390_v21 }
 0x3a8   :  { %v393_v24 = vrot.slane %v392_v23, 2 }
 0x3aa   :  { %v394_v25 = vadd.f32 %v393_v24, %v392_v23 }
 0x3ac   :  { %v395_v29 = vrot.slane %v394_v25, 1 }
 0x3ae   :  { %v396_v30 = vadd.f32 %v395_v29, %v394_v25 }
 0x3b0   :  { %v397_v31 = vmax.f32 %v396_v30, 1e-12 }
 0x3b2   :  { %1490 = vrcp.f32 %v397_v31  ;;  %v409_v35 = vand.u32 2147483648, %v397_v31  ;;  %v407_v37 = vand.u32 2147483647, %v397_v31  ;;  %vm403_vm7 = vweird.f32 %v397_v31 }
 0x3b4   :  { %v410_v39 = vor.u32 1.1754944e-38, %v409_v35  ;;  %vm408_vm9 = vcmp.eq.f32.partialorder %v407_v37, 8.507059e+37 }
 0x3b8   :  { %v1491_v32 = vpop.eup %1490 }
 0x3b9   :  { %v399_v33 = vmul.f32 %v1491_v32, %v397_v31  ;;  %vm404_vm6 = vweird.f32 %v1491_v32 }
 0x3ba   :  { %vm405_vm8 = vmor %vm403_vm7, %vm404_vm6 }
 0x3bb   :  { %v400_v34 = vsub.f32 1.0, %v399_v33 }
 0x3bd   :  { %v401_v36 = vmul.f32 %v1491_v32, %v400_v34 }
 0x3bf   :  { %v402_v38 = vadd.f32 %v1491_v32, %v401_v36 }
 0x3c1   :  { %v406_v40 = vsel %vm405_vm8, %v1491_v32, %v402_v38 }
 0x3c2   :  { %v411_v41 = vsel %vm408_vm9, %v410_v39, %v406_v40 }
 0x3c3   :  { %v413_v42 = vmul.f32 %v411_v41, %v388_v19 }
 0x3c5   :  { %v414_v43 = vmul.f32 0.0625, %v413_v42 }
 0x3c7   :  { %v415_v44 = vand.u32 2147483647, %v414_v43 }
 0x3c9   :  { %v416_v45 = vsel %vm250_vm0, %v415_v44, 0.0 }
 0x3ca   :  { %417 = vadd.xlane.f32.xlu2 %v416_v45 }
 0x3e2   :  { %77 = vperm.xlu2 %1476, %v55_v26  }
 0x43d   :  { %v418_v46 = vpop.xlane.xlu2 %417 }
 0x43e   :  { %v419_v48 = vmax.f32 %v418_v46, 1e-12 }
 0x440   :  { %1492 = vrcp.f32 %v419_v48  ;;  %v431_v54 = vand.u32 2147483648, %v419_v48  ;;  %v429_v56 = vand.u32 2147483647, %v419_v48  ;;  %vm425_vm13 = vweird.f32 %v419_v48 }
 0x442   :  { %v432_v63 = vor.u32 1.1754944e-38, %v431_v54  ;;  %vm430_vm15 = vcmp.eq.f32.partialorder %v429_v56, 8.507059e+37 }
 0x445   :  { %v78_v59 = vpop.permute.xlu2 %77 }
 0x446   :  { %v1493_v51 = vpop.eup %1492  ;;  %v80_v2 = vmul.f32 %v1437_v58, %v78_v59 }
 0x447   :  { %v421_v52 = vmul.f32 %v1493_v51, %v419_v48  ;;  %vm426_vm12 = vweird.f32 %v1493_v51 }
 0x448   :  { %vm427_vm14 = vmor %vm425_vm13, %vm426_vm12  ;;  %v1744_v11 = vadd.f32 %v89_v4, %v80_v2 }
 0x449   :  { %v422_v53 = vsub.f32 1.0, %v421_v52 }
 0x44b   :  { %v423_v55 = vmul.f32 %v1493_v51, %v422_v53 }
 0x44d   :  { %v424_v62 = vadd.f32 %v1493_v51, %v423_v55 }
 0x44f   :  { %v428_v3 = vsel %vm427_vm14, %v1493_v51, %v424_v62 }
 0x450   :  { %v433_v6 = vsel %vm430_vm15, %v432_v63, %v428_v3 }
 0x451   :  { %v435_v8 = vmul.f32 %v433_v6, %v414_v43 }
 0x453   :  { %v436_v9 = vmul.f32 0.125, %v435_v8 }
 0x455   :  { %v437_v12 = vmul.f32 8.0, %v436_v9 }
 0x457   :  { %v438_v13 = vmul.f32 %v437_v12, %v1744_v11 }
 0x459   :  { %v439_v14 = vsel %vm250_vm0, %v438_v13, -inf }
 0x45a   :  { %440 = vmax.xlane.f32.xlu1 %v439_v14 }
 0x4cd   :  { %v441_v15 = vpop.xlane.xlu1 %440 }
 0x4ce   :  { %vm442_vm1 = vcmp.ge.f32.partialorder %v438_v13, %v441_v15 }
 0x4cf   :  { %v1439_v17 = vsel %vm442_vm1, 1.0, %v1644_v57 }
 0x4d0   :  { %vm446_vm2 = vcmp.gt.f32.partialorder %v1439_v17, 0.0  ;;  %v445_v21 = vmax.f32 %v1439_v17, 0.0 }
 0x4d1   :  { %v447_v18 = vsel %vm446_vm2, -inf, %v438_v13 }
 0x4d2   :  { %v448_v19 = vsel %vm250_vm0, %v447_v18, -inf }
 0x4d3   :  { %449 = vmax.xlane.f32.xlu1 %v448_v19 }
 0x546   :  { %v450_v20 = vpop.xlane.xlu1 %449 }
 0x547   :  { %vm451_vm3 = vcmp.ge.f32.partialorder %v447_v18, %v450_v20 }
 0x548   :  { %v1440_v22 = vsel %vm451_vm3, 1.0, %v1644_v57  ;;  %vm561_vm3 = vcmask 64512  }
 0x549   :  { %v454_v23 = vmax.f32 %v445_v21, %v1440_v22  ;;  %vm455_vm4 = vcmp.gt.f32.partialorder %v1440_v22, 0.0 }
 0x54a   :  { %v456_v24 = vsel %vm455_vm4, -inf, %v447_v18 }
 0x54b   :  { %v457_v25 = vsel %vm250_vm0, %v456_v24, -inf }
 0x54c   :  { %458 = vmax.xlane.f32.xlu1 %v457_v25 }
 0x5bf   :  { %v459_v26 = vpop.xlane.xlu1 %458 }
 0x5c0   :  { %vm460_vm5 = vcmp.ge.f32.partialorder %v456_v24, %v459_v26 }
 0x5c1   :  { %v1441_v27 = vsel %vm460_vm5, 1.0, %v1644_v57 }
 0x5c2   :  { %v463_v28 = vmax.f32 %v454_v23, %v1441_v27  ;;  %vm464_vm6 = vcmp.gt.f32.partialorder %v1441_v27, 0.0 }
 0x5c3   :  { %v465_v29 = vsel %vm464_vm6, -inf, %v456_v24  ;;  %v591_v24 = vld [vmem:[#allocation5] sm:$0xff] }
 0x5c4   :  { %v466_v30 = vsel %vm250_vm0, %v465_v29, -inf }
 0x5c5   :  { %467 = vmax.xlane.f32.xlu2 %v466_v30 }
 0x638   :  { %v468_v31 = vpop.xlane.xlu2 %467 }
 0x639   :  { %vm469_vm7 = vcmp.ge.f32.partialorder %v465_v29, %v468_v31 }
 0x63a   :  { %v1442_v32 = vsel %vm469_vm7, 1.0, %v1644_v57 }
 0x63b   :  { %v472_v33 = vmax.f32 %v463_v28, %v1442_v32  ;;  %vm473_vm8 = vcmp.gt.f32.partialorder %v1442_v32, 0.0  ;;  %v592_v28 = vld [vmem:[#allocation5 + $0x8] sm:$0xff] }
 0x63c   :  { %v474_v34 = vsel %vm473_vm8, -inf, %v465_v29  ;;  %v621_v29 = vmul.f32 0.99, %v1694_v0 }
 0x63d   :  { %v475_v35 = vsel %vm250_vm0, %v474_v34, -inf }
 0x63e   :  { %476 = vmax.xlane.f32.xlu1 %v475_v35  ;;  %v620_v35 = vmul.f32 0.99, %v1696_v1 }
 0x6b1   :  { %v477_v36 = vpop.xlane.xlu1 %476 }
 0x6b2   :  { %vm478_vm9 = vcmp.ge.f32.partialorder %v474_v34, %v477_v36 }
 0x6b3   :  { %v1443_v37 = vsel %vm478_vm9, 1.0, %v1644_v57 }
 0x6b4   :  { %v481_v38 = vmax.f32 %v472_v33, %v1443_v37 }
 0x6b6   :  { %v482_v39 = vmul.f32 %v481_v38, %v438_v13 }
 0x6b8   :  { %v483_v40 = vand.u32 2147483647, %v482_v39 }
 0x6ba   :  { %v484_v41 = vsel %vm250_vm0, %v483_v40, 0.0 }
 0x6bb   :  { %485 = vadd.xlane.f32.xlu1 %v484_v41 }
 0x72e   :  { %v486_v42 = vpop.xlane.xlu1 %485 }
 0x72f   :  { %v487_v43 = vmax.f32 %v486_v42, 1e-12 }
 0x731   :  { %1494 = vrcp.f32 %v487_v43  ;;  %v499_v48 = vand.u32 2147483648, %v487_v43  ;;  %v497_v52 = vand.u32 2147483647, %v487_v43  ;;  %vm493_vm11 = vweird.f32 %v487_v43 }
 0x733   :  { %v500_v54 = vor.u32 1.1754944e-38, %v499_v48  ;;  %vm498_vm13 = vcmp.eq.f32.partialorder %v497_v52, 8.507059e+37 }
 0x737   :  { %v1495_v44 = vpop.eup %1494 }
 0x738   :  { %v489_v45 = vmul.f32 %v1495_v44, %v487_v43  ;;  %vm494_vm10 = vweird.f32 %v1495_v44 }
 0x739   :  { %vm495_vm12 = vmor %vm493_vm11, %vm494_vm10 }
 0x73a   :  { %v490_v46 = vsub.f32 1.0, %v489_v45 }
 0x73c   :  { %v491_v51 = vmul.f32 %v1495_v44, %v490_v46 }
 0x73e   :  { %v492_v53 = vadd.f32 %v1495_v44, %v491_v51 }
 0x740   :  { %v496_v55 = vsel %vm495_vm12, %v1495_v44, %v492_v53 }
 0x741   :  { %v501_v56 = vsel %vm498_vm13, %v500_v54, %v496_v55 }
 0x742   :  { %v503_v58 = vmul.f32 %v501_v56, %v482_v39 }
 0x744   :  { %v504_v59 = vand.u32 2147483647, %v503_v58 }
 0x746   :  { %v505_v60 = vsel %vm250_vm0, %v504_v59, 0.0 }
 0x747   :  { %v506_v61 = vrot.slane %v505_v60, 4 }
 0x749   :  { %v507_v62 = vadd.f32 %v506_v61, %v505_v60 }
 0x74b   :  { %v508_v63 = vrot.slane %v507_v62, 2 }
 0x74d   :  { %v509_v2 = vadd.f32 %v508_v63, %v507_v62 }
 0x74f   :  { %v510_v3 = vrot.slane %v509_v2, 1 }
 0x751   :  { %v511_v4 = vadd.f32 %v510_v3, %v509_v2 }
 0x753   :  { %v512_v6 = vmax.f32 %v511_v4, 1e-12 }
 0x755   :  { %1496 = vrcp.f32 %v512_v6  ;;  %v524_v13 = vand.u32 2147483648, %v512_v6  ;;  %v522_v15 = vand.u32 2147483647, %v512_v6  ;;  %vm518_vm15 = vweird.f32 %v512_v6 }
 0x757   :  { %v525_v18 = vor.u32 1.1754944e-38, %v524_v13  ;;  %vm523_vm2 = vcmp.eq.f32.partialorder %v522_v15, 8.507059e+37 }
 0x75b   :  { %v1497_v8 = vpop.eup %1496 }
 0x75c   :  { %v514_v9 = vmul.f32 %v1497_v8, %v512_v6  ;;  %vm519_vm14 = vweird.f32 %v1497_v8 }
 0x75d   :  { %vm520_vm1 = vmor %vm518_vm15, %vm519_vm14 }
 0x75e   :  { %v515_v12 = vsub.f32 1.0, %v514_v9 }
 0x760   :  { %v516_v14 = vmul.f32 %v1497_v8, %v515_v12 }
 0x762   :  { %v517_v17 = vadd.f32 %v1497_v8, %v516_v14 }
 0x764   :  { %v521_v19 = vsel %vm520_vm1, %v1497_v8, %v517_v17 }
 0x765   :  { %v526_v20 = vsel %vm523_vm2, %v525_v18, %v521_v19 }
 0x766   :  { %v1759_v21 = vmul.f32 %v526_v20, %v503_v58 }
 0x768   :  { %529 = vxpose.xlu0.b32.start.end [1/1] (short) (narrow) %v1759_v21, 16 }
 0x80c   :  { %v545_v22 = vpop.trf.xlu0 }
 0x80d   :  { %1444 = vmatmul.msk.f32.vlgmr.msra.gmra.mxu2 %vm561_vm3, %v545_v22  ;;  %1446 = vmatmul.msk.f32.vlgmr.msra.gmra.mxu3 %vm561_vm3, %v545_v22 }
 0x814   :  { %v546_v23 = vpop.trf.xlu0 }
 0x815   :  { %1445 = vmatmul.msk.f32.gmra.mxu2 %vm561_vm3, %v546_v23  ;;  %1447 = vmatmul.msk.f32.gmra.mxu3 %vm561_vm3, %v546_v23 }
 0x890   :  { %v585_v25 = vpop.f32.mrf.mxu2  ;;  %v610_v26 = vpop.f32.mrf.mxu3 }
 0x891   :  { %v616_v27 = vadd.f32 %v610_v26, %v591_v24  ;;  %v622_v36 = vmul.f32 0.01, %v585_v25 }
 0x893   :  { %618 = vst [vmem:[#allocation8] sm:$0xff] %v616_v27  ;;  %v1764_v38 = vadd.f32 %v622_v36, %v620_v35 }
 0x895   :  { %v626_v39 = vmul.f32 %v1764_v38, %v1764_v38 }
 0x898   :  { %v588_v30 = vpop.f32.mrf.mxu2  ;;  %v613_v31 = vpop.f32.mrf.mxu3 }
 0x899   :  { %v623_v32 = vmul.f32 0.01, %v588_v30  ;;  %v617_v33 = vadd.f32 %v613_v31, %v592_v28 }
 0x89b   :  { %v625_v34 = vadd.f32 %v623_v32, %v621_v29  ;;  %619 = vst [vmem:[#allocation8 + $0x8] sm:$0xff] %v617_v33 }
 0x89c   :  { %1422 = dma.vmem_to_hbm [thread:$0]  %s1415_s19, 256, %s1417_s22, [#allocation9], %s1639_s29, %s1639_s29, %s1640_s30  }
 0x89d   :  { %v627_v37 = vmul.f32 %v625_v34, %v625_v34 }
 0x89f   :  { %630 = vadd.xlane.f32.xlu1 %v627_v37 }
 0x8a7   :  { %628 = vadd.xlane.f32.xlu1 %v626_v39 }
 0x912   :  { %v631_v40 = vpop.xlane.xlu1 %630 }
 0x913   :  { %1498 = vrsqrt.f32 %v631_v40  ;;  %vm651_vm4 = vcmp.eq.f32.partialorder %v631_v40, inf  ;;  %v654_v53 = vand.u32 2147483648, %v631_v40  ;;  %vm653_vm5 = vcmp.eq.f32.partialorder %v631_v40, 0.0 }
 0x919   :  { %v1499_v0 = vpop.eup %1498 }
 0x91a   :  { %v645_v41 = vmul.f32 %v1499_v0, %v631_v40  ;;  %v629_v42 = vpop.xlane.xlu1 %628 }
 0x91b   :  { %1500 = vrsqrt.f32 %v629_v42  ;;  %vm639_vm6 = vcmp.eq.f32.partialorder %v629_v42, inf  ;;  %v642_v62 = vand.u32 2147483648, %v629_v42  ;;  %vm641_vm7 = vcmp.eq.f32.partialorder %v629_v42, 0.0 }
 0x91c   :  { %v646_v43 = vmul.f32 %v1499_v0, %v645_v41 }
 0x91e   :  { %v647_v44 = vmul.f32 0.5, %v646_v43 }
 0x920   :  { %v648_v45 = vsub.f32 1.5, %v647_v44 }
 0x921   :  { %v1501_v46 = vpop.eup %1500 }
 0x922   :  { %v649_v1 = vmul.f32 %v1499_v0, %v648_v45  ;;  %v633_v48 = vmul.f32 %v1501_v46, %v629_v42 }
 0x924   :  { %v650_v51 = vmul.f32 %v649_v1, %v631_v40  ;;  %v634_v52 = vmul.f32 %v1501_v46, %v633_v48 }
 0x926   :  { %v652_v54 = vsel %vm651_vm4, %v631_v40, %v650_v51  ;;  %v635_v55 = vmul.f32 0.5, %v634_v52 }
 0x927   :  { %v655_v56 = vsel %vm653_vm5, %v654_v53, %v652_v54 }
 0x928   :  { %v657_v58 = vmax.f32 %v655_v56, 1e-12  ;;  %v636_v59 = vsub.f32 1.5, %v635_v55 }
 0x92a   :  { %1502 = vrcp.f32 %v657_v58  ;;  %v637_v60 = vmul.f32 %v1501_v46, %v636_v59  ;;  %v684_v9 = vand.u32 2147483648, %v657_v58  ;;  %v682_v13 = vand.u32 2147483647, %v657_v58 }
 0x92b   :  { %vm678_vm9 = vweird.f32 %v657_v58 }
 0x92c   :  { %v638_v61 = vmul.f32 %v637_v60, %v629_v42  ;;  %v685_v15 = vor.u32 1.1754944e-38, %v684_v9  ;;  %vm683_vm11 = vcmp.eq.f32.partialorder %v682_v13, 8.507059e+37 }
 0x92e   :  { %v640_v63 = vsel %vm639_vm6, %v629_v42, %v638_v61 }
 0x92f   :  { %v643_v3 = vsel %vm641_vm7, %v642_v62, %v640_v63 }
 0x930   :  { %v1503_v2 = vpop.eup %1502  ;;  %v656_v6 = vmax.f32 %v643_v3, 1e-12 }
 0x931   :  { %v674_v4 = vmul.f32 %v1503_v2, %v657_v58  ;;  %vm679_vm8 = vweird.f32 %v1503_v2 }
 0x932   :  { %1504 = vrcp.f32 %v656_v6  ;;  %vm680_vm10 = vmor %vm678_vm9, %vm679_vm8  ;;  %v669_v25 = vand.u32 2147483648, %v656_v6  ;;  %v667_v27 = vand.u32 2147483647, %v656_v6  ;;  %vm663_vm13 = vweird.f32 %v656_v6 }
 0x933   :  { %v675_v8 = vsub.f32 1.0, %v674_v4 }
 0x934   :  { %v670_v30 = vor.u32 1.1754944e-38, %v669_v25  ;;  %vm668_vm15 = vcmp.eq.f32.partialorder %v667_v27, 8.507059e+37 }
 0x935   :  { %v676_v12 = vmul.f32 %v1503_v2, %v675_v8 }
 0x937   :  { %v677_v14 = vadd.f32 %v1503_v2, %v676_v12 }
 0x938   :  { %v1505_v17 = vpop.eup %1504 }
 0x939   :  { %v681_v18 = vsel %vm680_vm10, %v1503_v2, %v677_v14  ;;  %v659_v20 = vmul.f32 %v1505_v17, %v656_v6  ;;  %vm664_vm12 = vweird.f32 %v1505_v17 }
 0x93a   :  { %v686_v19 = vsel %vm683_vm11, %v685_v15, %v681_v18  ;;  %vm665_vm14 = vmor %vm663_vm13, %vm664_vm12 }
 0x93b   :  { %v689_v22 = vmul.f32 %v686_v19, %v625_v34  ;;  %v660_v23 = vsub.f32 1.0, %v659_v20 }
 0x93d   :  { %v1768_v24 = vand.u32 4294901760, %v689_v22  ;;  %691 = vst [vmem:[#allocation7 + $0x8] sm:$0xff] %v689_v22  ;;  %v661_v26 = vmul.f32 %v1505_v17, %v660_v23 }
 0x93f   :  { %707 = vmatpush.xpose.msrb.mxu0 %v1768_v24  ;;  %843 = vmatpush.xpose.msrb.mxu3 %v1768_v24  ;;  %v734_v28 = vsub.f32 %v689_v22, %v1768_v24  ;;  %v662_v29 = vadd.f32 %v1505_v17, %v661_v26 }
 0x941   :  { %v735_v31 = vand.u32 4294901760, %v734_v28  ;;  %v666_v32 = vsel %vm665_vm14, %v1505_v17, %v662_v29 }
 0x942   :  { %v671_v33 = vsel %vm668_vm15, %v670_v30, %v666_v32 }
 0x943   :  { %818 = vmatpush.xpose.msrb.mxu2 %v735_v31  ;;  %v736_v34 = vsub.f32 %v734_v28, %v735_v31  ;;  %v688_v35 = vmul.f32 %v671_v33, %v1764_v38 }
 0x945   :  { %v737_v36 = vand.u32 4294901760, %v736_v34  ;;  %v708_v37 = vand.u32 4294901760, %v688_v35  ;;  %690 = vst [vmem:[#allocation7] sm:$0xff] %v688_v35 }
 0x946   :  { %1409 = dma.vmem_to_hbm [thread:$0]  %s1402_s14, 256, %s1404_s17, [#allocation4], %s1639_s29, %s1639_s29, %s1640_s30  }
 0x947   :  { %738 = vmatpush.xpose.msrb.mxu1 %v737_v36  ;;  %709 = vmatpush.xpose.msrb.mxu0 %v708_v37  ;;  %v740_v39 = vsub.f32 %v688_v35, %v708_v37 }
 0x948   :  { %845 = vmatpush.xpose.msrb.mxu3 %v708_v37 }
 0x949   :  { %v741_v40 = vand.u32 4294901760, %v740_v39 }
 0x94a   :  { %715 = vmatmul.f32.vlgmr.msrb.gmra.mxu0 %v1715_v16 }
 0x94b   :  { %766 = vmatpush.xpose.msra.mxu0 %v734_v28  ;;  %847 = vmatmul.f32.vlgmr.msrb.gmra.mxu3 %v1703_v5  ;;  %v742_v0 = vsub.f32 %v740_v39, %v741_v40 }
 0x94c   :  { %1260 = vmatpush.xpose.msra.mxu3 %v1768_v24  ;;  %822 = vmatpush.xpose.msrb.mxu2 %v741_v40 }
 0x94d   :  { %v743_v38 = vand.u32 4294901760, %v742_v0 }
 0x94f   :  { %769 = vmatpush.xpose.msra.mxu0 %v740_v39  ;;  %824 = vmatmul.f32.vlgmr.msrb.gmra.mxu2 %v1703_v5 }
 0x950   :  { %1230 = vmatpush.xpose.msra.mxu2 %v734_v28  ;;  %1262 = vmatpush.xpose.msra.mxu3 %v708_v37 }
 0x951   :  { %744 = vmatpush.xpose.msrb.mxu1 %v743_v38 }
 0x952   :  { %772 = vmatmul.f32.vlgmr.msra.gmra.mxu0 %v1707_v7 }
 0x953   :  { %1159 = vmatpush.xpose.msrb.mxu0 %v1768_v24  ;;  %1266 = vmatmul.f32.vlgmr.msra.gmra.mxu3 %v741_v40 }
 0x954   :  { %1233 = vmatpush.xpose.msra.mxu2 %v740_v39  ;;  %746 = vmatmul.f32.vlgmr.msrb.gmra.mxu1 %v1703_v5 }
 0x955   :  { %791 = vmatpush.xpose.msra.mxu1 %v1768_v24 }
 0x957   :  { %1161 = vmatpush.xpose.msrb.mxu0 %v708_v37  ;;  %1236 = vmatmul.f32.vlgmr.msra.gmra.mxu2 %v740_v39 }
 0x959   :  { %793 = vmatpush.xpose.msra.mxu1 %v708_v37 }
 0x95a   :  { %1167 = vmatmul.f32.vlgmr.msrb.gmra.mxu0 %v743_v38 }
 0x95b   :  { %1293 = vmatpush.xpose.msra.mxu0 %v735_v31  ;;  %1272 = vmatmul.f32.gmra.mxu3 %v735_v31 }
 0x95c   :  { %797 = vmatmul.f32.vlgmr.msra.gmra.mxu1 %v1711_v10 }
 0x95d   :  { %1198 = vmatpush.xpose.msrb.mxu1 %v737_v36 }
 0x95f   :  { %1297 = vmatpush.xpose.msra.mxu0 %v741_v40  ;;  %1241 = vmatmul.f32.gmra.mxu2 %v734_v28 }
 0x961   :  { %1204 = vmatpush.xpose.msrb.mxu1 %v743_v38 }
 0x962   :  { %1175 = vmatmul.f32.gmra.mxu0 %v737_v36 }
 0x964   :  { %1206 = vmatmul.f32.vlgmr.msrb.gmra.mxu1 %v708_v37 }
 0x965   :  { %1322 = vmatpush.xpose.msra.mxu1 %v1768_v24 }
 0x969   :  { %1324 = vmatpush.xpose.msra.mxu1 %v708_v37 }
 0x96a   :  { %1299 = vmatmul.f32.vlgmr.msra.gmra.mxu0 %v708_v37 }
 0x96c   :  { %1210 = vmatmul.f32.gmra.mxu1 %v1768_v24 }
 0x972   :  { %1303 = vmatmul.f32.gmra.mxu0 %v1768_v24 }
 0x974   :  { %1326 = vmatmul.f32.vlgmr.msra.gmra.mxu1 %v708_v37 }
 0x97c   :  { %1330 = vmatmul.f32.gmra.mxu1 %v1768_v24 }
 0x9c7   :  { %v716_v5 = vpop.f32.mrf.mxu0 }
 0x9ce   :  { %v848_v46 = vpop.f32.mrf.mxu3 }
 0x9cf   :  { %v773_v16 = vpop.f32.mrf.mxu0 }
 0x9d1   :  { %v747_v7 = vpop.f32.mrf.mxu1 }
 0x9d2   :  { %v748_v10 = vadd.f32 %v747_v7, %v716_v5  ;;  %v825_v42 = vpop.f32.mrf.mxu2 }
 0x9d4   :  { %v774_v41 = vadd.f32 %v773_v16, %v748_v10 }
 0x9d6   :  { %v1267_v59 = vpop.f32.mrf.mxu3 }
 0x9d7   :  { %v1168_v44 = vpop.f32.mrf.mxu0 }
 0x9d9   :  { %v798_v43 = vpop.f32.mrf.mxu1 }
 0x9da   :  { %v799_v45 = vadd.f32 %v798_v43, %v774_v41  ;;  %v1237_v56 = vpop.f32.mrf.mxu2 }
 0x9dc   :  { %v826_v1 = vadd.f32 %v825_v42, %v799_v45 }
 0x9de   :  { %v849_v48 = vadd.f32 %v848_v46, %v826_v1  ;;  %v1273_v9 = vpop.f32.mrf.mxu3 }
 0x9df   :  { %v1176_v52 = vpop.f32.mrf.mxu0 }
 0x9e0   :  { %v1787_v51 = vmul.f32 10.0, %v849_v48 }
 0x9e1   :  { %v1207_v53 = vpop.f32.mrf.mxu1 }
 0x9e2   :  { %v1208_v54 = vadd.f32 %v1207_v53, %v1168_v44  ;;  %v852_v55 = vsel %vm250_vm0, %v1787_v51, -inf  ;;  %v1242_v3 = vpop.f32.mrf.mxu2 }
 0x9e3   :  { %853 = vmax.xlane.f32.xlu1 %v852_v55 }
 0x9e4   :  { %v1238_v58 = vadd.f32 %v1237_v56, %v1208_v54 }
 0x9e6   :  { %v1268_v60 = vadd.f32 %v1267_v59, %v1238_v58 }
 0x9e7   :  { %v1300_v62 = vpop.f32.mrf.mxu0 }
 0x9e8   :  { %v1301_v63 = vadd.f32 %v1300_v62, %v1268_v60 }
 0x9e9   :  { %v1211_v61 = vpop.f32.mrf.mxu1 }
 0x9ea   :  { %v1212_v2 = vadd.f32 %v1211_v61, %v1176_v52 }
 0x9ec   :  { %v1243_v6 = vadd.f32 %v1242_v3, %v1212_v2 }
 0x9ee   :  { %v1274_v13 = vadd.f32 %v1273_v9, %v1243_v6 }
 0x9ef   :  { %v1304_v12 = vpop.f32.mrf.mxu0 }
 0x9f0   :  { %v1305_v14 = vadd.f32 %v1304_v12, %v1274_v13 }
 0x9f1   :  { %v1327_v4 = vpop.f32.mrf.mxu1 }
 0x9f2   :  { %v1791_v8 = vadd.f32 %v1327_v4, %v1301_v63 }
 0x9f9   :  { %v1331_v15 = vpop.f32.mrf.mxu1 }
 0x9fa   :  { %v1332_v17 = vadd.f32 %v1331_v15, %v1305_v14 }
 0x9fc   :  { %v1793_v18 = vmul.f32 2.0, %v1332_v17 }
 0x9fe   :  { %v1339_v19 = vsel %vm250_vm0, %v1793_v18, -inf }
 0x9ff   :  { %1340 = vmax.xlane.f32.xlu0 %v1339_v19 }
 0xa56   :  { %v854_v20 = vpop.xlane.xlu1 %853 }
 0xa57   :  { %v855_v22 = vrot.slane %v854_v20, 4 }
 0xa59   :  { %v856_v23 = vmax.f32 %v854_v20, %v855_v22 }
 0xa5b   :  { %v857_v24 = vrot.slane %v856_v23, 2 }
 0xa5d   :  { %v858_v25 = vmax.f32 %v856_v23, %v857_v24 }
 0xa5f   :  { %v859_v26 = vrot.slane %v858_v25, 1 }
 0xa61   :  { %v860_v27 = vmax.f32 %v858_v25, %v859_v26 }
 0xa63   :  { %1457 = vpush %v860_v27 }
 0xa94   :  { %s1797_s1 = spop %1457 }
 0xa95   :  { %v862_v28 = vstv %s1797_s1 }
 0xa96   :  { %v863_v29 = vsub.f32 %v1787_v51, %v862_v28 }
 0xa98   :  { %v864_v30 = vmul.f32 1.442695, %v863_v29 }
 0xa9a   :  { %1506 = vpow2.f32 %v864_v30 }
 0xaa0   :  { %v1803_v31 = vpop.eup %1506 }
 0xaa1   :  { %v866_v32 = vmul.f32 %v1803_v31, %v1803_v31 }
 0xaa3   :  { %v867_v33 = vsel %vm250_vm0, %v866_v32, 0.0 }
 0xaa4   :  { %868 = vadd.xlane.f32.xlu2 %v867_v33 }
 0xb17   :  { %v869_v34 = vpop.xlane.xlu2 %868 }
 0xb18   :  { %v870_v35 = vrot.slane %v869_v34, 4 }
 0xb1a   :  { %v871_v36 = vadd.f32 %v870_v35, %v869_v34 }
 0xb1c   :  { %v872_v37 = vrot.slane %v871_v36, 2 }
 0xb1e   :  { %v873_v39 = vadd.f32 %v872_v37, %v871_v36 }
 0xb20   :  { %v874_v40 = vrot.slane %v873_v39, 1 }
 0xb22   :  { %v875_v0 = vadd.f32 %v874_v40, %v873_v39 }
 0xb24   :  { %1459 = vpush %v875_v0 }
 0xb55   :  { %s1460_s12 = spop %1459 }
 0xb56   :  { %v877_v38 = vstv %s1460_s12 }
 0xb57   :  { %1508 = vrcp.f32 %v877_v38  ;;  %v889_v10 = vand.u32 2147483648, %v877_v38  ;;  %v887_v42 = vand.u32 2147483647, %v877_v38  ;;  %vm883_vm2 = vweird.f32 %v877_v38 }
 0xb59   :  { %v890_v44 = vor.u32 1.1754944e-38, %v889_v10  ;;  %vm888_vm4 = vcmp.eq.f32.partialorder %v887_v42, 8.507059e+37 }
 0xb5d   :  { %v1509_v5 = vpop.eup %1508 }
 0xb5e   :  { %v879_v7 = vmul.f32 %v1509_v5, %v877_v38  ;;  %vm884_vm1 = vweird.f32 %v1509_v5 }
 0xb5f   :  { %vm885_vm3 = vmor %vm883_vm2, %vm884_vm1 }
 0xb60   :  { %v880_v16 = vsub.f32 1.0, %v879_v7 }
 0xb62   :  { %v881_v41 = vmul.f32 %v1509_v5, %v880_v16 }
 0xb64   :  { %v882_v43 = vadd.f32 %v1509_v5, %v881_v41 }
 0xb66   :  { %v886_v45 = vsel %vm885_vm3, %v1509_v5, %v882_v43 }
 0xb67   :  { %v891_v46 = vsel %vm888_vm4, %v890_v44, %v886_v45 }
 0xb68   :  { %v893_v1 = vmul.f32 %v891_v46, %v866_v32 }
 0xb6a   :  { %v894_v48 = vand.u32 2147483647, %v893_v1 }
 0xb6c   :  { %v895_v52 = vsel %vm250_vm0, %v894_v48, 0.0 }
 0xb6d   :  { %v896_v53 = vrot.slane %v895_v52, 4 }
 0xb6f   :  { %v897_v54 = vadd.f32 %v896_v53, %v895_v52 }
 0xb71   :  { %v898_v55 = vrot.slane %v897_v54, 2 }
 0xb73   :  { %v899_v56 = vadd.f32 %v898_v55, %v897_v54 }
 0xb75   :  { %v900_v58 = vrot.slane %v899_v56, 1 }
 0xb77   :  { %v901_v59 = vadd.f32 %v900_v58, %v899_v56  ;;  %v1341_v58 = vpop.xlane.xlu0 %1340 }
 0xb79   :  { %v902_v60 = vmax.f32 %v901_v59, 1e-12 }
 0xb7b   :  { %1510 = vrcp.f32 %v902_v60  ;;  %v914_v2 = vand.u32 2147483648, %v902_v60  ;;  %v912_v4 = vand.u32 2147483647, %v902_v60  ;;  %vm908_vm6 = vweird.f32 %v902_v60 }
 0xb7d   :  { %v915_v9 = vor.u32 1.1754944e-38, %v914_v2  ;;  %vm913_vm8 = vcmp.eq.f32.partialorder %v912_v4, 8.507059e+37 }
 0xb81   :  { %v1511_v61 = vpop.eup %1510 }
 0xb82   :  { %v904_v62 = vmul.f32 %v1511_v61, %v902_v60  ;;  %vm909_vm5 = vweird.f32 %v1511_v61  ;;  %v1813_v60 = vshrl.u32 %v58_v47, 7  ;;  %v1069_v47 = vsel %vm250_vm0, %v1803_v31, 0.0 }
 0xb83   :  { %vm910_vm7 = vmor %vm908_vm6, %vm909_vm5 }
 0xb84   :  { %v905_v63 = vsub.f32 1.0, %v904_v62  ;;  %v1817_v62 = vmul.f32 2.0, %v1791_v8 }
 0xb86   :  { %v906_v3 = vmul.f32 %v1511_v61, %v905_v63  ;;  %v1103_v63 = vadd.s32 8, %v1813_v60 }
 0xb88   :  { %v907_v6 = vadd.f32 %v1511_v61, %v906_v3  ;;  %v1336_v3 = vsel %vm250_vm0, %v1817_v62, -inf  ;;  %v1121_v4 = vand.u32 1, %v1103_v63  ;;  %vm1105_vm2 = vcmp.ne.s32.totalorder %v1103_v63, %v1735_v49 }
 0xb89   :  { %v1450_v8 = vsel %vm1105_vm2, 1.0, %v1644_v57  ;;  %vm1104_vm2 = vcmp.ne.s32.totalorder %v1813_v60, %v1735_v49 }
 0xb8a   :  { %v911_v12 = vsel %vm910_vm7, %v1511_v61, %v907_v6  ;;  %v1343_v61 = vsub.f32 %v1793_v18, %v1341_v58  ;;  %vm1135_vm3 = vcmp.eq.s32.totalorder %v1121_v4, %v1738_v50 }
 0xb8b   :  { %v916_v13 = vsel %vm913_vm8, %v915_v9, %v911_v12  ;;  %v1452_v6 = vsel %vm1135_vm3, 1.0, %v1644_v57 }
 0xb8c   :  { %v918_v14 = vmul.f32 %v916_v13, %v893_v1  ;;  %v1354_v2 = vmul.f32 1.442695, %v1343_v61  ;;  %v1141_v9 = vmul.f32 %v1452_v6, %v1450_v8 }
 0xb8e   :  { %v919_v15 = vmul.f32 0.0625, %v918_v14  ;;  %v1143_v14 = vmul.f32 0.14285715, %v1141_v9 }
 0xb90   :  { %v920_v17 = vand.u32 2147483647, %v919_v15 }
 0xb92   :  { %v921_v19 = vsel %vm250_vm0, %v920_v17, 0.0 }
 0xb93   :  { %922 = vadd.xlane.f32.xlu1 %v921_v19 }
 0xc06   :  { %v923_v20 = vpop.xlane.xlu1 %922 }
 0xc07   :  { %v924_v22 = vmax.f32 %v923_v20, 1e-12 }
 0xc09   :  { %1512 = vrcp.f32 %v924_v22  ;;  %v936_v26 = vand.u32 2147483648, %v924_v22  ;;  %v934_v29 = vand.u32 2147483647, %v924_v22  ;;  %vm930_vm10 = vweird.f32 %v924_v22 }
 0xc0b   :  { %v937_v32 = vor.u32 1.1754944e-38, %v936_v26  ;;  %vm935_vm12 = vcmp.eq.f32.partialorder %v934_v29, 8.507059e+37 }
 0xc0f   :  { %v1513_v23 = vpop.eup %1512 }
 0xc10   :  { %v926_v24 = vmul.f32 %v1513_v23, %v924_v22  ;;  %vm931_vm9 = vweird.f32 %v1513_v23 }
 0xc11   :  { %vm932_vm11 = vmor %vm930_vm10, %vm931_vm9 }
 0xc12   :  { %v927_v25 = vsub.f32 1.0, %v926_v24 }
 0xc14   :  { %v928_v27 = vmul.f32 %v1513_v23, %v927_v25 }
 0xc16   :  { %v929_v30 = vadd.f32 %v1513_v23, %v928_v27 }
 0xc18   :  { %v933_v33 = vsel %vm932_vm11, %v1513_v23, %v929_v30 }
 0xc19   :  { %v938_v34 = vsel %vm935_vm12, %v937_v32, %v933_v33 }
 0xc1a   :  { %v940_v35 = vmul.f32 %v938_v34, %v919_v15  ;;  %v1345_v15 = vmul.f32 %v1343_v61, %v1143_v14 }
 0xc1c   :  { %v941_v36 = vmul.f32 0.125, %v940_v35  ;;  %v1349_v17 = vsel %vm250_vm0, %v1345_v15, 0.0 }
 0xc1e   :  { %v942_v37 = vand.u32 2147483647, %v941_v36 }
 0xc20   :  { %v943_v39 = vsel %vm250_vm0, %v942_v37, 0.0 }
 0xc21   :  { %v944_v40 = vrot.slane %v943_v39, 4 }
 0xc23   :  { %v945_v0 = vadd.f32 %v944_v40, %v943_v39 }
 0xc25   :  { %v946_v38 = vrot.slane %v945_v0, 2 }
 0xc27   :  { %v947_v5 = vadd.f32 %v946_v38, %v945_v0 }
 0xc29   :  { %v948_v7 = vrot.slane %v947_v5, 1 }
 0xc2b   :  { %v949_v16 = vadd.f32 %v948_v7, %v947_v5 }
 0xc2d   :  { %v950_v10 = vmax.f32 %v949_v16, 1e-12 }
 0xc2f   :  { %1514 = vrcp.f32 %v950_v10  ;;  %v962_v44 = vand.u32 2147483648, %v950_v10  ;;  %v960_v46 = vand.u32 2147483647, %v950_v10  ;;  %vm956_vm14 = vweird.f32 %v950_v10 }
 0xc30   :  { %1516 = vpow2.f32 %v1354_v2 }
 0xc31   :  { %v963_v48 = vor.u32 1.1754944e-38, %v962_v44  ;;  %vm961_vm1 = vcmp.eq.f32.partialorder %v960_v46, 8.507059e+37 }
 0xc35   :  { %v1515_v41 = vpop.eup %1514 }
 0xc36   :  { %v952_v42 = vmul.f32 %v1515_v41, %v950_v10  ;;  %vm957_vm13 = vweird.f32 %v1515_v41  ;;  %v1517_v18 = vpop.eup %1516 }
 0xc37   :  { %vm958_vm15 = vmor %vm956_vm14, %vm957_vm13  ;;  %v1357_v12 = vmul.f32 %v1517_v18, %v1450_v8 }
 0xc38   :  { %v953_v43 = vsub.f32 1.0, %v952_v42 }
 0xc39   :  { %v1361_v13 = vsel %vm250_vm0, %v1357_v12, 0.0 }
 0xc3a   :  { %v954_v45 = vmul.f32 %v1515_v41, %v953_v43 }
 0xc3c   :  { %v955_v1 = vadd.f32 %v1515_v41, %v954_v45 }
 0xc3e   :  { %v959_v52 = vsel %vm958_vm15, %v1515_v41, %v955_v1 }
 0xc3f   :  { %v964_v53 = vsel %vm961_vm1, %v963_v48, %v959_v52  ;;  %vm1039_vm1 = vcmp.gt.f32.partialorder %v1759_v21, 0.0  ;;  %v1449_v21 = vsel %vm1104_vm2, 1.0, %v1644_v57 }
 0xc40   :  { %v966_v54 = vmul.f32 %v964_v53, %v941_v36 }
 0xc42   :  { %v967_v55 = vmul.f32 0.0625, %v966_v54 }
 0xc44   :  { %v968_v56 = vand.u32 2147483647, %v967_v55 }
 0xc46   :  { %v969_v59 = vsel %vm250_vm0, %v968_v56, 0.0 }
 0xc47   :  { %970 = vadd.xlane.f32.xlu2 %v969_v59 }
 0xc4f   :  { %1337 = vmax.xlane.f32.xlu2 %v1336_v3 }
 0xc57   :  { %1070 = vadd.xlane.f32.xlu2 %v1069_v47 }
 0xc5f   :  { %1362 = vadd.xlane.f32.xlu2 %v1361_v13 }
 0xc67   :  { %1350 = vadd.xlane.f32.xlu2 %v1349_v17 }
 0xcba   :  { %v971_v19 = vpop.xlane.xlu2 %970 }
 0xcbb   :  { %v972_v20 = vmax.f32 %v971_v19, 1e-12 }
 0xcbd   :  { %1518 = vrcp.f32 %v972_v20  ;;  %v984_v24 = vand.u32 2147483648, %v972_v20  ;;  %v982_v26 = vand.u32 2147483647, %v972_v20  ;;  %vm978_vm5 = vweird.f32 %v972_v20 }
 0xcbf   :  { %v985_v29 = vor.u32 1.1754944e-38, %v984_v24  ;;  %vm983_vm7 = vcmp.eq.f32.partialorder %v982_v26, 8.507059e+37 }
 0xcc2   :  { %v1338_v47 = vpop.xlane.xlu2 %1337 }
 0xcc3   :  { %v1519_v31 = vpop.eup %1518  ;;  %v1342_v9 = vsub.f32 %v1817_v62, %v1338_v47 }
 0xcc4   :  { %v974_v22 = vmul.f32 %v1519_v31, %v972_v20  ;;  %vm979_vm4 = vweird.f32 %v1519_v31  ;;  %v1114_v20 = vand.u32 1, %v1813_v60 }
 0xcc5   :  { %vm980_vm6 = vmor %vm978_vm5, %vm979_vm4  ;;  %v1352_v15 = vmul.f32 1.442695, %v1342_v9 }
 0xcc6   :  { %v975_v23 = vsub.f32 1.0, %v974_v22  ;;  %vm1134_vm3 = vcmp.eq.s32.totalorder %v1114_v20, %v1738_v50 }
 0xcc8   :  { %v976_v25 = vmul.f32 %v1519_v31, %v975_v23 }
 0xcca   :  { %v977_v27 = vadd.f32 %v1519_v31, %v976_v25 }
 0xccc   :  { %v981_v30 = vsel %vm980_vm6, %v1519_v31, %v977_v27  ;;  %v1448_v31 = vsel %vm1039_vm1, 1.0, %v1644_v57 }
 0xccd   :  { %v986_v32 = vsel %vm983_vm7, %v985_v29, %v981_v30 }
 0xcce   :  { %v988_v33 = vmul.f32 %v986_v32, %v967_v55 }
 0xcd0   :  { %v989_v34 = vmul.f32 0.125, %v988_v33 }
 0xcd2   :  { %v990_v35 = vand.u32 2147483647, %v989_v34 }
 0xcd4   :  { %v991_v36 = vsel %vm250_vm0, %v990_v35, 0.0  ;;  %v1071_v35 = vpop.xlane.xlu2 %1070 }
 0xcd5   :  { %v992_v37 = vrot.slane %v991_v36, 4 }
 0xcd7   :  { %v993_v39 = vadd.f32 %v992_v37, %v991_v36 }
 0xcd9   :  { %v994_v40 = vrot.slane %v993_v39, 2 }
 0xcdb   :  { %v995_v0 = vadd.f32 %v994_v40, %v993_v39 }
 0xcdd   :  { %v996_v38 = vrot.slane %v995_v0, 1 }
 0xcdf   :  { %v997_v5 = vadd.f32 %v996_v38, %v995_v0 }
 0xce1   :  { %v998_v7 = vmax.f32 %v997_v5, 1e-12 }
 0xce3   :  { %1520 = vrcp.f32 %v998_v7  ;;  %v1010_v42 = vand.u32 2147483648, %v998_v7  ;;  %v1008_v44 = vand.u32 2147483647, %v998_v7  ;;  %vm1004_vm9 = vweird.f32 %v998_v7 }
 0xce5   :  { %v1011_v46 = vor.u32 1.1754944e-38, %v1010_v42  ;;  %vm1009_vm11 = vcmp.eq.f32.partialorder %v1008_v44, 8.507059e+37 }
 0xce9   :  { %v1521_v16 = vpop.eup %1520 }
 0xcea   :  { %v1000_v10 = vmul.f32 %v1521_v16, %v998_v7  ;;  %vm1005_vm8 = vweird.f32 %v1521_v16 }
 0xceb   :  { %vm1006_vm10 = vmor %vm1004_vm9, %vm1005_vm8  ;;  %vm1075_vm8 = vcmask 7168   ;;  %vm1386_vm9 = vcmp.eq.s32.totalorder %v1735_v49, 0 }
 0xcec   :  { %v1001_v41 = vsub.f32 1.0, %v1000_v10 }
 0xcee   :  { %v1002_v43 = vmul.f32 %v1521_v16, %v1001_v41 }
 0xcf0   :  { %v1003_v45 = vadd.f32 %v1521_v16, %v1002_v43 }
 0xcf2   :  { %v1007_v1 = vsel %vm1006_vm10, %v1521_v16, %v1003_v45  ;;  %vm1391_vm10 = vcmp.eq.s32.totalorder %v1735_v49, 2 }
 0xcf3   :  { %v1012_v48 = vsel %vm1009_vm11, %v1011_v46, %v1007_v1  ;;  %v1363_v46 = vpop.xlane.xlu2 %1362 }
 0xcf4   :  { %v1014_v52 = vmul.f32 %v1012_v48, %v989_v34 }
 0xcf6   :  { %v1015_v53 = vmul.f32 0.0625, %v1014_v52 }
 0xcf8   :  { %v1016_v54 = vand.u32 2147483647, %v1015_v53 }
 0xcfa   :  { %v1017_v55 = vsel %vm250_vm0, %v1016_v54, 0.0 }
 0xcfb   :  { %1018 = vadd.xlane.f32.xlu1 %v1017_v55 }
 0xd6e   :  { %v1019_v56 = vpop.xlane.xlu1 %1018 }
 0xd6f   :  { %v1020_v58 = vmax.f32 %v1019_v56, 1e-12 }
 0xd71   :  { %1522 = vrcp.f32 %v1020_v58  ;;  %v1032_v2 = vand.u32 2147483648, %v1020_v58  ;;  %v1030_v4 = vand.u32 2147483647, %v1020_v58  ;;  %vm1026_vm13 = vweird.f32 %v1020_v58 }
 0xd72   :  { %1524 = vpow2.f32 %v1352_v15 }
 0xd73   :  { %v1033_v8 = vor.u32 1.1754944e-38, %v1032_v2  ;;  %vm1031_vm15 = vcmp.eq.f32.partialorder %v1030_v4, 8.507059e+37 }
 0xd77   :  { %v1523_v59 = vpop.eup %1522 }
 0xd78   :  { %v1022_v61 = vmul.f32 %v1523_v59, %v1020_v58  ;;  %vm1027_vm12 = vweird.f32 %v1523_v59  ;;  %v1525_v24 = vpop.eup %1524 }
 0xd79   :  { %vm1028_vm14 = vmor %vm1026_vm13, %vm1027_vm12  ;;  %v1356_v26 = vmul.f32 %v1525_v24, %v1449_v21 }
 0xd7a   :  { %v1023_v63 = vsub.f32 1.0, %v1022_v61 }
 0xd7b   :  { %v1358_v27 = vsel %vm250_vm0, %v1356_v26, 0.0 }
 0xd7c   :  { %v1024_v3 = vmul.f32 %v1523_v59, %v1023_v63 }
 0xd7e   :  { %v1025_v18 = vadd.f32 %v1523_v59, %v1024_v3 }
 0xd80   :  { %v1029_v6 = vsel %vm1028_vm14, %v1523_v59, %v1025_v18 }
 0xd81   :  { %v1034_v12 = vsel %vm1031_vm15, %v1033_v8, %v1029_v6 }
 0xd82   :  { %v1036_v13 = vmul.f32 %v1034_v12, %v1015_v53 }
 0xd84   :  { %v1037_v14 = vmul.f32 0.125, %v1036_v13 }
 0xd86   :  { %v1038_v17 = vmul.f32 8.0, %v1037_v14 }
 0xd88   :  { %v1042_v19 = vmul.f32 %v1038_v17, %v1744_v11  ;;  %v1451_v11 = vsel %vm1134_vm3, 1.0, %v1644_v57 }
 0xd89   :  { %v1140_v25 = vmul.f32 %v1451_v11, %v1449_v21 }
 0xd8a   :  { %v1043_v22 = vmul.f32 %v1448_v31, %v1042_v19 }
 0xd8b   :  { %v1142_v29 = vmul.f32 0.14285715, %v1140_v25 }
 0xd8c   :  { %v1044_v23 = vand.u32 2147483647, %v1043_v22 }
 0xd8d   :  { %v1344_v30 = vmul.f32 %v1342_v9, %v1142_v29 }
 0xd8e   :  { %v1045_v62 = vsel %vm250_vm0, %v1044_v23, 0.0 }
 0xd8f   :  { %1046 = vadd.xlane.f32.xlu1 %v1045_v62  ;;  %v1346_v32 = vsel %vm250_vm0, %v1344_v30, 0.0 }
 0xd97   :  { %1359 = vadd.xlane.f32.xlu1 %v1358_v27 }
 0xd9f   :  { %1347 = vadd.xlane.f32.xlu1 %v1346_v32 }
 0xe02   :  { %v1047_v60 = vpop.xlane.xlu1 %1046 }
 0xe03   :  { %v1048_v50 = vmax.f32 %v1047_v60, 1e-12 }
 0xe05   :  { %1526 = vrcp.f32 %v1048_v50  ;;  %v1060_v37 = vand.u32 2147483648, %v1048_v50  ;;  %v1058_v57 = vand.u32 2147483647, %v1048_v50  ;;  %vm1054_vm5 = vweird.f32 %v1048_v50 }
 0xe06   :  { %1528 = vlog2.f32 %v1071_v35 }
 0xe07   :  { %v1061_v0 = vor.u32 1.1754944e-38, %v1060_v37  ;;  %vm1059_vm7 = vcmp.eq.f32.partialorder %v1058_v57, 8.507059e+37 }
 0xe0a   :  { %v1360_v45 = vpop.xlane.xlu1 %1359 }
 0xe0b   :  { %v1527_v33 = vpop.eup %1526  ;;  %1530 = vlog2.f32 %v1360_v45 }
 0xe0c   :  { %v1050_v34 = vmul.f32 %v1527_v33, %v1048_v50  ;;  %vm1055_vm4 = vweird.f32 %v1527_v33  ;;  %v1529_v16 = vpop.eup %1528  ;;  %1532 = vlog2.f32 %v1363_v46 }
 0xe0d   :  { %vm1056_vm6 = vmor %vm1054_vm5, %vm1055_vm4  ;;  %v1073_v41 = vmul.f32 0.6931472, %v1529_v16 }
 0xe0e   :  { %v1051_v36 = vsub.f32 1.0, %v1050_v34 }
 0xe0f   :  { %v1074_v43 = vadd.f32 %v1073_v41, %v862_v28 }
 0xe10   :  { %v1052_v39 = vmul.f32 %v1527_v33, %v1051_v36 }
 0xe11   :  { %v1087_v44 = vsel %vm1075_vm8, %v1074_v43, 0.0  ;;  %v1531_v48 = vpop.eup %1530 }
 0xe12   :  { %v1053_v40 = vadd.f32 %v1527_v33, %v1052_v39  ;;  %v1348_v1 = vpop.xlane.xlu1 %1347  ;;  %v1533_v52 = vpop.eup %1532  ;;  %v1365_v53 = vmul.f32 0.6931472, %v1531_v48 }
 0xe13   :  { %v1367_v54 = vmul.f32 0.6931472, %v1533_v52 }
 0xe14   :  { %v1057_v38 = vsel %vm1056_vm6, %v1527_v33, %v1053_v40  ;;  %v1368_v56 = vsub.f32 %v1348_v1, %v1365_v53 }
 0xe15   :  { %v1062_v5 = vsel %vm1059_vm7, %v1061_v0, %v1057_v38 }
 0xe16   :  { %v1064_v7 = vmul.f32 %v1062_v5, %v1043_v22  ;;  %v1370_v59 = vsel %vm1075_vm8, %v1368_v56, 0.0 }
 0xe18   :  { %v1065_v10 = vmul.f32 %v1064_v7, %v1787_v51  ;;  %v1351_v51 = vpop.xlane.xlu2 %1350 }
 0xe19   :  { %v1369_v28 = vsub.f32 %v1351_v51, %v1367_v54 }
 0xe1a   :  { %v1066_v42 = vsel %vm250_vm0, %v1065_v10, 0.0  ;;  %vm1388_vm0 = vcmp.eq.s32.totalorder %v1735_v49, 1 }
 0xe1b   :  { %1067 = vadd.xlane.f32.xlu1 %v1066_v42  ;;  %v1371_v61 = vsel %vm1075_vm8, %v1369_v28, 0.0 }
 0xe1c   :  { %v1372_v63 = vadd.f32 %v1371_v61, %v1370_v59 }
 0xe23   :  { %1088 = vadd.xlane.f32.xlu1 %v1087_v44 }
 0xe8e   :  { %v1068_v55 = vpop.xlane.xlu1 %1067 }
 0xe8f   :  { %v1076_v58 = vsel %vm1075_vm8, %v1068_v55, 0.0 }
 0xe90   :  { %1077 = vadd.xlane.f32.xlu2 %v1076_v58 }
 0xe96   :  { %v1089_v2 = vpop.xlane.xlu1 %1088 }
 0xe97   :  { %v1090_v3 = vrot.slane %v1089_v2, 4 }
 0xe98   :  { %1373 = vadd.xlane.f32.xlu2 %v1372_v63 }
 0xe99   :  { %v1091_v4 = vadd.f32 %v1090_v3, %v1089_v2 }
 0xe9b   :  { %v1092_v47 = vrot.slane %v1091_v4, 2 }
 0xe9d   :  { %v1093_v9 = vadd.f32 %v1092_v47, %v1091_v4 }
 0xe9f   :  { %v1094_v15 = vrot.slane %v1093_v9, 1 }
 0xea1   :  { %v1095_v22 = vadd.f32 %v1094_v15, %v1093_v9 }
 0xf03   :  { %v1078_v18 = vpop.xlane.xlu2 %1077 }
 0xf04   :  { %v1079_v8 = vrot.slane %v1078_v18, 4 }
 0xf06   :  { %v1080_v6 = vadd.f32 %v1079_v8, %v1078_v18 }
 0xf08   :  { %v1081_v12 = vrot.slane %v1080_v6, 2 }
 0xf0a   :  { %v1082_v13 = vadd.f32 %v1081_v12, %v1080_v6 }
 0xf0b   :  { %v1374_v14 = vpop.xlane.xlu2 %1373 }
 0xf0c   :  { %v1375_v17 = vrot.slane %v1374_v14, 4  ;;  %v1083_v19 = vrot.slane %v1082_v13, 1 }
 0xf0e   :  { %v1376_v20 = vadd.f32 %v1375_v17, %v1374_v14  ;;  %v1084_v31 = vadd.f32 %v1083_v19, %v1082_v13 }
 0xf10   :  { %v1377_v23 = vrot.slane %v1376_v20, 2  ;;  %1461 = vpush %v1084_v31 }
 0xf11   :  { %1463 = vpush %v1095_v22 }
 0xf12   :  { %v1378_v62 = vadd.f32 %v1377_v23, %v1376_v20 }
 0xf14   :  { %v1379_v24 = vrot.slane %v1378_v62, 1 }
 0xf16   :  { %v1380_v21 = vadd.f32 %v1379_v24, %v1378_v62 }
 0xf18   :  { %1465 = vpush %v1380_v21 }
 0xf41   :  { %s1462_s5 = spop %1461 }
 0xf42   :  { %v1086_v11 = vstv %s1462_s5  ;;  %s1464_s6 = spop %1463 }
 0xf43   :  { %v1097_v25 = vstv %s1464_s6 }
 0xf44   :  { %v1098_v26 = vsub.f32 %v1086_v11, %v1097_v25 }
 0xf46   :  { %v1099_v27 = vsub.f32 0.0, %v1098_v26 }
 0xf48   :  { %v1100_v32 = vmul.f32 0.125, %v1099_v27 }
 0xf49   :  { %s1466_s23 = spop %1465 }
 0xf4a   :  { %v1382_v29 = vstv %s1466_s23  ;;  %v1389_v33 = vsel %vm1388_vm0, %v1100_v32, 0.0 }
 0xf4b   :  { %v1383_v30 = vsub.f32 0.0, %v1382_v29 }
 0xf4d   :  { %v1384_v60 = vmul.f32 0.0625, %v1383_v30 }
 0xf4f   :  { %v1385_v50 = vadd.f32 %v1384_v60, %v1100_v32  ;;  %v1392_v36 = vsel %vm1391_vm10, %v1384_v60, 0.0 }
 0xf51   :  { %v1387_v34 = vsel %vm1386_vm9, %v1385_v50, 0.0 }
 0xf52   :  { %v1390_v35 = vadd.f32 %v1389_v33, %v1387_v34 }
 0xf54   :  { %v1393_v37 = vadd.f32 %v1392_v36, %v1390_v35 }
 0xf56   :  { %1394 = vst [vmem:[%s1875_s4] sm:$0x1] %v1393_v37 }
 0xf57   :  { %1634 = dma.done.wait [#allocation4], 256  }
 0xf58   :  { %1635 = vsyncadd [#allocation4], 4294967040 }
 0xf59   :  { %1636 = dma.done.wait [#allocation9], 256  }
 0xf5a   :  { %1637 = vsyncadd [#allocation9], 4294967040 }
 0xf5b   :  { %1433 = vsyncpa [#allocation3], 1 }
 0xf5c   :  { %1434 = vsyncpa [#allocation6], 1 }
 0xf5d   :  { %1435 = vsyncpa [#allocation4], 1 }
 0xf5e   :  { %1436 = vsyncpa [#allocation9], 1 }

</bundles_post_ra>
